<compile_context>
chip_gen: v6e
topology: v6e:2x2x1
jax: 0.10.0
libtpu: 0.0.40
codegen_flags: <defaults>
</compile_context>

<pallas_src>
import math
import functools

import jax
import jax.numpy as jnp
from jax.experimental import pallas as pl
from jax.experimental.pallas import tpu as pltpu


# ----------------------------------------------------------------------------
# Fused attention sub-layer kernel:
#   out = LayerNorm( OutProj( MHA(x_q, x_kv, mask) ) + x_q )
# One grid step per batch element; everything stays in VMEM.
# ----------------------------------------------------------------------------

def _attn_block_kernel(xq_ref, xkv_ref, wqkv_ref, bqkv_ref, wo_ref, bo_ref,
                       fill_ref, lnw_ref, lnb_ref, o_ref, ctx_ref,
                       *, num_heads, scale, eps):
    xq = xq_ref[0]                       # (Sq, h)
    xkv = xkv_ref[0]                     # (Sk, h)
    h = xq.shape[-1]
    dk = h // num_heads
    wqkv = wqkv_ref[...]                 # (h, 3h)   [Wq | Wk | Wv]
    bqkv = bqkv_ref[...]                 # (1, 3h)
    fill = fill_ref[0]                   # (Sq, Sk)  -1e9 where masked, +FLT_MAX otherwise

    # Fused projections on the MXU: Q from x_q (N=h), K|V from x_kv (N=2h).
    q = jnp.dot(xq, wqkv[:, :h], preferred_element_type=jnp.float32) + bqkv[:, :h]
    kv = jnp.dot(xkv, wqkv[:, h:], preferred_element_type=jnp.float32) + bqkv[:, h:]
    k = kv[:, :h]
    v = kv[:, h:]

    # Per-head attention; heads stay folded in the lane dim, sliced statically.
    for i in range(num_heads):
        lo, hi = i * dk, (i + 1) * dk
        qh, kh, vh = q[:, lo:hi], k[:, lo:hi], v[:, lo:hi]
        # Contract the shared last dim directly — no k.T materialization.
        s = jax.lax.dot_general(qh, kh, (((1,), (1,)), ((), ())),
                                preferred_element_type=jnp.float32) * scale
        # Exact masked_fill(mask, -1e9): min with (-1e9 / +FLT_MAX) fill values.
        s = jnp.minimum(s, fill)
        s = s - jnp.max(s, axis=-1, keepdims=True)
        e = jnp.exp(s)
        p = e * pl.reciprocal(jnp.sum(e, axis=-1, keepdims=True), approx=True)
        ctx_ref[:, lo:hi] = jnp.dot(p, vh, preferred_element_type=jnp.float32)

    attn = jnp.dot(ctx_ref[...], wo_ref[...], preferred_element_type=jnp.float32) + bo_ref[...]
    y = attn + xq                        # residual (post-norm layout)
    mean = jnp.mean(y, axis=-1, keepdims=True)
    yc = y - mean
    var = jnp.mean(yc * yc, axis=-1, keepdims=True)   # unbiased=False, matches PyTorch
    o_ref[0] = yc * jax.lax.rsqrt(var + eps) * lnw_ref[...] + lnb_ref[...]


def attention_block(p, ln_w, ln_b, x_q, x_kv, mask_fill, a, eps=1e-5):
    """x_q: (B, Sq, h) query/residual input; x_kv: (B, Sk, h); mask_fill: (B, Sq, Sk)."""
    B, Sq, h = x_q.shape
    Sk = x_kv.shape[1]
    dk = h // a
    scale = 1.0 / math.sqrt(dk)
    kernel = functools.partial(_attn_block_kernel, num_heads=a, scale=scale, eps=eps)
    return pl.pallas_call(
        kernel,
        out_shape=jax.ShapeDtypeStruct((B, Sq, h), jnp.float32),
        grid=(B,),
        in_specs=[
            pl.BlockSpec((1, Sq, h), lambda b: (b, 0, 0)),      # x_q
            pl.BlockSpec((1, Sk, h), lambda b: (b, 0, 0)),      # x_kv
            pl.BlockSpec((h, 3 * h), lambda b: (0, 0)),         # fused Wq|Wk|Wv
            pl.BlockSpec((1, 3 * h), lambda b: (0, 0)),         # fused bq|bk|bv
            pl.BlockSpec((h, h), lambda b: (0, 0)),             # out_proj W
            pl.BlockSpec((1, h), lambda b: (0, 0)),             # out_proj b
            pl.BlockSpec((1, Sq, Sk), lambda b: (b, 0, 0)),     # mask fill values
            pl.BlockSpec((1, h), lambda b: (0, 0)),             # LN weight
            pl.BlockSpec((1, h), lambda b: (0, 0)),             # LN bias
        ],
        out_specs=pl.BlockSpec((1, Sq, h), lambda b: (b, 0, 0)),
        scratch_shapes=[pltpu.VMEM((Sq, h), jnp.float32)],
        compiler_params=pltpu.CompilerParams(dimension_semantics=("parallel",)),
    )(x_q, x_kv, p["wqkv_w"], p["wqkv_b"].reshape(1, 3 * h),
      p["op_w"], p["op_b"].reshape(1, h), mask_fill,
      ln_w.reshape(1, h), ln_b.reshape(1, h))


# ----------------------------------------------------------------------------
# Fused feed-forward sub-layer kernel:
#   out = LayerNorm( W2(relu(W1 x + b1)) + b2 + x )
# The (S, 4h) intermediate never leaves VMEM.
# ----------------------------------------------------------------------------

def _ff_block_kernel(x_ref, w1_ref, b1_ref, w2_ref, b2_ref, lnw_ref, lnb_ref, o_ref, *, eps):
    x = x_ref[0]                         # (S, h)
    hmid = jnp.maximum(
        jnp.dot(x, w1_ref[...], preferred_element_type=jnp.float32) + b1_ref[...], 0.0)
    y = jnp.dot(hmid, w2_ref[...], preferred_element_type=jnp.float32) + b2_ref[...] + x
    mean = jnp.mean(y, axis=-1, keepdims=True)
    yc = y - mean
    var = jnp.mean(yc * yc, axis=-1, keepdims=True)
    o_ref[0] = yc * jax.lax.rsqrt(var + eps) * lnw_ref[...] + lnb_ref[...]


def ff_block(p, ln_w, ln_b, x, eps=1e-5):
    B, S, h = x.shape
    hid = p["w1_w"].shape[1]
    kernel = functools.partial(_ff_block_kernel, eps=eps)
    return pl.pallas_call(
        kernel,
        out_shape=jax.ShapeDtypeStruct((B, S, h), jnp.float32),
        grid=(B,),
        in_specs=[
            pl.BlockSpec((1, S, h), lambda b: (b, 0, 0)),       # x (also residual)
            pl.BlockSpec((h, hid), lambda b: (0, 0)),           # W1
            pl.BlockSpec((1, hid), lambda b: (0, 0)),           # b1
            pl.BlockSpec((hid, h), lambda b: (0, 0)),           # W2
            pl.BlockSpec((1, h), lambda b: (0, 0)),             # b2
            pl.BlockSpec((1, h), lambda b: (0, 0)),             # LN weight
            pl.BlockSpec((1, h), lambda b: (0, 0)),             # LN bias
        ],
        out_specs=pl.BlockSpec((1, S, h), lambda b: (b, 0, 0)),
        compiler_params=pltpu.CompilerParams(dimension_semantics=("parallel",)),
    )(x, p["w1_w"], p["w1_b"].reshape(1, hid), p["w2_w"], p["w2_b"].reshape(1, h),
      ln_w.reshape(1, h), ln_b.reshape(1, h))


# ----------------------------------------------------------------------------
# JAX glue: embedding gather, positional encoding, mask construction
# ----------------------------------------------------------------------------

def positional_encoding_table(max_len, h):
    position = jnp.arange(max_len, dtype=jnp.float32)[:, None]
    div_term = jnp.exp(jnp.arange(0, h, 2, dtype=jnp.float32) * (-math.log(10000.0) / h))
    pe = jnp.zeros((max_len, h), dtype=jnp.float32)
    pe = pe.at[:, 0::2].set(jnp.sin(position * div_term))
    pe = pe.at[:, 1::2].set(jnp.cos(position * div_term))
    return pe[None]                                          # (1, max_len, h)


def embed(params, ids, S):
    # nn.Linear on a one-hot == row gather of the (v, h) transposed weight + bias.
    return jnp.take(params["emb_w"], ids, axis=0) + params["emb_b"] + params["pe"][:, :S]


_NEG = jnp.float32(-1.0e9)
_BIG = jnp.float32(jnp.finfo(jnp.float32).max)


def make_fill(mask_bool, B, Sq, Sk):
    """Pre-bake masked_fill values: -1e9 where masked, +FLT_MAX otherwise (applied via min)."""
    fill = jnp.where(mask_bool, _NEG, _BIG).astype(jnp.float32)
    return jnp.broadcast_to(fill, (B, Sq, Sk))


# ----------------------------------------------------------------------------
# Full Transformer forward (norm_first=False, post-norm, dropout p=0)
# ----------------------------------------------------------------------------

def transformer_forward(params, src, tgt, *, v, h, a):
    B, Ss = src.shape
    _, St = tgt.shape

    src_pad = src == 1                                        # (B, Ss) bool
    tgt_pad = tgt == 1                                        # (B, St) bool
    seq_mask = jnp.triu(jnp.ones((St, St), dtype=bool), k=1)  # (St, St) bool

    enc_fill = make_fill(src_pad[:, None, :], B, Ss, Ss)
    dec_fill = make_fill(jnp.logical_or(seq_mask[None, :, :], tgt_pad[:, None, :]), B, St, St)
    cross_fill = make_fill(src_pad[:, None, :], B, St, Ss)

    src_x = embed(params, src, Ss)
    tgt_x = embed(params, tgt, St)

    # encoder stack (post-norm)
    for enc in params["encoders"]:
        src_x = attention_block(enc["attn"], enc["ln1_w"], enc["ln1_b"],
                                src_x, src_x, enc_fill, a)
        src_x = ff_block(enc["ff"], enc["ln2_w"], enc["ln2_b"], src_x)

    # decoder stack (post-norm)
    for dec in params["decoders"]:
        tgt_x = attention_block(dec["self_attn"], dec["ln1_w"], dec["ln1_b"],
                                tgt_x, tgt_x, dec_fill, a)
        tgt_x = attention_block(dec["cross_attn"], dec["ln2_w"], dec["ln2_b"],
                                tgt_x, src_x, cross_fill, a)
        tgt_x = ff_block(dec["ff"], dec["ln3_w"], dec["ln3_b"], tgt_x)

    # TODO(synk): Transformer.forward never applies self.predict; prediction params are
    # initialized for parity but intentionally not used here.
    return tgt_x


# ----------------------------------------------------------------------------
# Deterministic parameter initialization (PyTorch nn.Linear-style uniform init)
# ----------------------------------------------------------------------------

def init_linear(key, fan_in, fan_out):
    k1, k2 = jax.random.split(key)
    bound = 1.0 / math.sqrt(fan_in)
    w = jax.random.uniform(k1, (fan_in, fan_out), jnp.float32, -bound, bound)
    b = jax.random.uniform(k2, (fan_out,), jnp.float32, -bound, bound)
    return w, b


def init_attention_params(key, h):
    ks = jax.random.split(key, 4)
    wq_w, wq_b = init_linear(ks[0], h, h)
    wk_w, wk_b = init_linear(ks[1], h, h)
    wv_w, wv_b = init_linear(ks[2], h, h)
    op_w, op_b = init_linear(ks[3], h, h)
    return dict(wqkv_w=jnp.concatenate([wq_w, wk_w, wv_w], axis=1),   # (h, 3h)
                wqkv_b=jnp.concatenate([wq_b, wk_b, wv_b]),           # (3h,)
                op_w=op_w, op_b=op_b)


def init_ff_params(key, h):
    hidden = 4 * h                       # FeedForward default hiddenDim = 4*h
    k1, k2 = jax.random.split(key)
    w1_w, w1_b = init_linear(k1, h, hidden)
    w2_w, w2_b = init_linear(k2, hidden, h)
    return dict(w1_w=w1_w, w1_b=w1_b, w2_w=w2_w, w2_b=w2_b)


def init_params(key, v, h, a, num_encoder_layers, num_decoder_layers, max_len):
    keys = jax.random.split(key, 2 + num_encoder_layers + num_decoder_layers)
    emb_w, emb_b = init_linear(keys[0], v, h)
    pred_w, pred_b = init_linear(keys[1], h, v)               # unused in forward (see TODO)
    params = dict(emb_w=emb_w, emb_b=emb_b, pred_w=pred_w, pred_b=pred_b,
                  pe=positional_encoding_table(max_len, h),
                  encoders=[], decoders=[])
    for i in range(num_encoder_layers):
        k_attn, k_ff = jax.random.split(keys[2 + i])
        params["encoders"].append(dict(
            attn=init_attention_params(k_attn, h),
            ln1_w=jnp.ones((h,), jnp.float32), ln1_b=jnp.zeros((h,), jnp.float32),
            ff=init_ff_params(k_ff, h),
            ln2_w=jnp.ones((h,), jnp.float32), ln2_b=jnp.zeros((h,), jnp.float32)))
    for i in range(num_decoder_layers):
        k_sa, k_ca, k_ff = jax.random.split(keys[2 + num_encoder_layers + i], 3)
        params["decoders"].append(dict(
            self_attn=init_attention_params(k_sa, h),
            ln1_w=jnp.ones((h,), jnp.float32), ln1_b=jnp.zeros((h,), jnp.float32),
            cross_attn=init_attention_params(k_ca, h),
            ln2_w=jnp.ones((h,), jnp.float32), ln2_b=jnp.zeros((h,), jnp.float32),
            ff=init_ff_params(k_ff, h),
            ln3_w=jnp.ones((h,), jnp.float32), ln3_b=jnp.zeros((h,), jnp.float32)))
    return params


# ----------------------------------------------------------------------------
# Main
# ----------------------------------------------------------------------------

if __name__ == "__main__":
    V, H, A = 16, 32, 4            # vocab, hidden, heads  (d_k = 8)
    NUM_ENC, NUM_DEC = 2, 2
    DIM_FF = 64                    # accepted but ignored, matching the PyTorch module
    MAX_LEN = 64
    B, S_SRC, S_TGT = 2, 8, 8

    key = jax.random.PRNGKey(0)
    p_key, s_key, t_key = jax.random.split(key, 3)

    params = init_params(p_key, V, H, A, NUM_ENC, NUM_DEC, MAX_LEN)

    src = jax.random.randint(s_key, (B, S_SRC), 0, V, dtype=jnp.int32)
    tgt = jax.random.randint(t_key, (B, S_TGT), 0, V, dtype=jnp.int32)
    # force a couple of pad tokens (id == 1) so the padding masks are actually exercised
    src = src.at[:, -1].set(1)
    tgt = tgt.at[:, -2:].set(1)

    fwd = jax.jit(functools.partial(transformer_forward, v=V, h=H, a=A))
    out = fwd(params, src, tgt)
    jax.block_until_ready(out)

    assert out.shape == (B, S_TGT, H)
    assert out.dtype == jnp.float32
    assert bool(jnp.all(jnp.isfinite(out)))
    print("KERNEL_OK")
</pallas_src>

<mosaic_0001>
module attributes {stable_mosaic.version = 11 : i64} {
  func.func @_ff_block_kernel(%arg0: i32, %arg1: memref<1x8x32xf32, #tpu.memory_space<vmem>>, %arg2: memref<32x128xf32, #tpu.memory_space<vmem>>, %arg3: memref<1x128xf32, #tpu.memory_space<vmem>>, %arg4: memref<128x32xf32, #tpu.memory_space<vmem>>, %arg5: memref<1x32xf32, #tpu.memory_space<vmem>>, %arg6: memref<1x32xf32, #tpu.memory_space<vmem>>, %arg7: memref<1x32xf32, #tpu.memory_space<vmem>>, %arg8: memref<1x8x32xf32, #tpu.memory_space<vmem>>) attributes {dimension_semantics = [#tpu.dimension_semantics<parallel>], iteration_bounds = array<i64: 2>, scalar_prefetch = 0 : i64, scratch_operands = 0 : i64, tpu.core_type = #tpu.core_type<tc>, window_params = [{transform_indices = @transform_0, window_bounds = array<i64: 1, 8, 32>}, {pipeline_mode = #tpu.pipeline_mode<synchronous>, transform_indices = @transform_1, window_bounds = array<i64: 32, 128>}, {pipeline_mode = #tpu.pipeline_mode<synchronous>, transform_indices = @transform_2, window_bounds = array<i64: 1, 128>}, {pipeline_mode = #tpu.pipeline_mode<synchronous>, transform_indices = @transform_3, window_bounds = array<i64: 128, 32>}, {pipeline_mode = #tpu.pipeline_mode<synchronous>, transform_indices = @transform_4, window_bounds = array<i64: 1, 32>}, {pipeline_mode = #tpu.pipeline_mode<synchronous>, transform_indices = @transform_5, window_bounds = array<i64: 1, 32>}, {pipeline_mode = #tpu.pipeline_mode<synchronous>, transform_indices = @transform_6, window_bounds = array<i64: 1, 32>}, {transform_indices = @transform_7, window_bounds = array<i64: 1, 8, 32>}]} {
    %c0 = arith.constant 0 : index
    %c0_0 = arith.constant 0 : index
    %c0_1 = arith.constant 0 : index
    %0 = vector.load %arg1[%c0, %c0_0, %c0_1] : memref<1x8x32xf32, #tpu.memory_space<vmem>>, vector<1x8x32xf32>
    %1 = vector.shape_cast %0 : vector<1x8x32xf32> to vector<8x32xf32>
    %c0_2 = arith.constant 0 : index
    %c0_3 = arith.constant 0 : index
    %2 = vector.load %arg2[%c0_2, %c0_3] : memref<32x128xf32, #tpu.memory_space<vmem>>, vector<32x128xf32>
    %cst = arith.constant dense<0.000000e+00> : vector<8x128xf32>
    %3 = tpu.matmul %1, %2, %cst {dimension_numbers = #tpu.dot_dimension_numbers<[1], [0], [0], [1], [0, 0, 1, 1], [], []>} : vector<8x32xf32>, vector<32x128xf32>, vector<8x128xf32> -> vector<8x128xf32>
    %c0_4 = arith.constant 0 : index
    %c0_5 = arith.constant 0 : index
    %4 = vector.load %arg3[%c0_4, %c0_5] : memref<1x128xf32, #tpu.memory_space<vmem>>, vector<1x128xf32>
    %5 = vector.broadcast %4 : vector<1x128xf32> to vector<8x128xf32>
    %6 = arith.addf %3, %5 : vector<8x128xf32>
    %cst_6 = arith.constant 0.000000e+00 : f32
    %7 = vector.broadcast %cst_6 : f32 to vector<8x128xf32>
    %8 = arith.maximumf %6, %7 : vector<8x128xf32>
    %c0_7 = arith.constant 0 : index
    %c0_8 = arith.constant 0 : index
    %9 = vector.load %arg4[%c0_7, %c0_8] : memref<128x32xf32, #tpu.memory_space<vmem>>, vector<128x32xf32>
    %cst_9 = arith.constant dense<0.000000e+00> : vector<8x32xf32>
    %10 = tpu.matmul %8, %9, %cst_9 {dimension_numbers = #tpu.dot_dimension_numbers<[1], [0], [0], [1], [0, 0, 1, 1], [], []>} : vector<8x128xf32>, vector<128x32xf32>, vector<8x32xf32> -> vector<8x32xf32>
    %c0_10 = arith.constant 0 : index
    %c0_11 = arith.constant 0 : index
    %11 = vector.load %arg5[%c0_10, %c0_11] : memref<1x32xf32, #tpu.memory_space<vmem>>, vector<1x32xf32>
    %12 = vector.broadcast %11 : vector<1x32xf32> to vector<8x32xf32>
    %13 = arith.addf %10, %12 : vector<8x32xf32>
    %14 = arith.addf %13, %1 : vector<8x32xf32>
    %cst_12 = arith.constant dense<0.000000e+00> : vector<8xf32>
    %15 = vector.multi_reduction <add>, %14, %cst_12 [1] : vector<8x32xf32> to vector<8xf32>
    %16 = vector.shape_cast %15 : vector<8xf32> to vector<8x1xf32>
    %cst_13 = arith.constant 3.200000e+01 : f32
    %17 = vector.broadcast %cst_13 : f32 to vector<8x1xf32>
    %18 = arith.divf %16, %17 : vector<8x1xf32>
    %19 = vector.broadcast %18 : vector<8x1xf32> to vector<8x32xf32>
    %20 = arith.subf %14, %19 : vector<8x32xf32>
    %21 = arith.mulf %20, %20 : vector<8x32xf32>
    %cst_14 = arith.constant dense<0.000000e+00> : vector<8xf32>
    %22 = vector.multi_reduction <add>, %21, %cst_14 [1] : vector<8x32xf32> to vector<8xf32>
    %23 = vector.shape_cast %22 : vector<8xf32> to vector<8x1xf32>
    %cst_15 = arith.constant 3.200000e+01 : f32
    %24 = vector.broadcast %cst_15 : f32 to vector<8x1xf32>
    %25 = arith.divf %23, %24 : vector<8x1xf32>
    %cst_16 = arith.constant 9.99999974E-6 : f32
    %26 = vector.broadcast %cst_16 : f32 to vector<8x1xf32>
    %27 = arith.addf %25, %26 : vector<8x1xf32>
    %28 = math.rsqrt %27 : vector<8x1xf32>
    %29 = vector.broadcast %28 : vector<8x1xf32> to vector<8x32xf32>
    %30 = arith.mulf %20, %29 : vector<8x32xf32>
    %c0_17 = arith.constant 0 : index
    %c0_18 = arith.constant 0 : index
    %31 = vector.load %arg6[%c0_17, %c0_18] : memref<1x32xf32, #tpu.memory_space<vmem>>, vector<1x32xf32>
    %32 = vector.broadcast %31 : vector<1x32xf32> to vector<8x32xf32>
    %33 = arith.mulf %30, %32 : vector<8x32xf32>
    %c0_19 = arith.constant 0 : index
    %c0_20 = arith.constant 0 : index
    %34 = vector.load %arg7[%c0_19, %c0_20] : memref<1x32xf32, #tpu.memory_space<vmem>>, vector<1x32xf32>
    %35 = vector.broadcast %34 : vector<1x32xf32> to vector<8x32xf32>
    %36 = arith.addf %33, %35 : vector<8x32xf32>
    %c0_21 = arith.constant 0 : index
    %c0_22 = arith.constant 0 : index
    %c0_23 = arith.constant 0 : index
    %37 = vector.load %arg8[%c0_21, %c0_22, %c0_23] : memref<1x8x32xf32, #tpu.memory_space<vmem>>, vector<1x8x32xf32>
    %38 = vector.shape_cast %37 : vector<1x8x32xf32> to vector<8x32xf32>
    %39 = vector.shape_cast %36 : vector<8x32xf32> to vector<1x8x32xf32>
    tpu.vector_store %arg8[%c0_21, %c0_22, %c0_23], %39 {strides = array<i32>} : memref<1x8x32xf32, #tpu.memory_space<vmem>>, vector<1x8x32xf32>,
    return
  }
  func.func @transform_0(%arg0: i32) -> (i32, i32, i32) {
    %c0_i32 = arith.constant 0 : i32
    %c0_i32_0 = arith.constant 0 : i32
    %c0_i32_1 = arith.constant 0 : i32
    return %arg0, %c0_i32, %c0_i32_0 : i32, i32, i32
  }
  func.func @transform_1(%arg0: i32) -> (i32, i32) {
    %c0_i32 = arith.constant 0 : i32
    %c0_i32_0 = arith.constant 0 : i32
    %c0_i32_1 = arith.constant 0 : i32
    return %c0_i32, %c0_i32_0 : i32, i32
  }
  func.func @transform_2(%arg0: i32) -> (i32, i32) {
    %c0_i32 = arith.constant 0 : i32
    %c0_i32_0 = arith.constant 0 : i32
    %c0_i32_1 = arith.constant 0 : i32
    return %c0_i32, %c0_i32_0 : i32, i32
  }
  func.func @transform_3(%arg0: i32) -> (i32, i32) {
    %c0_i32 = arith.constant 0 : i32
    %c0_i32_0 = arith.constant 0 : i32
    %c0_i32_1 = arith.constant 0 : i32
    return %c0_i32, %c0_i32_0 : i32, i32
  }
  func.func @transform_4(%arg0: i32) -> (i32, i32) {
    %c0_i32 = arith.constant 0 : i32
    %c0_i32_0 = arith.constant 0 : i32
    %c0_i32_1 = arith.constant 0 : i32
    return %c0_i32, %c0_i32_0 : i32, i32
  }
  func.func @transform_5(%arg0: i32) -> (i32, i32) {
    %c0_i32 = arith.constant 0 : i32
    %c0_i32_0 = arith.constant 0 : i32
    %c0_i32_1 = arith.constant 0 : i32
    return %c0_i32, %c0_i32_0 : i32, i32
  }
  func.func @transform_6(%arg0: i32) -> (i32, i32) {
    %c0_i32 = arith.constant 0 : i32
    %c0_i32_0 = arith.constant 0 : i32
    %c0_i32_1 = arith.constant 0 : i32
    return %c0_i32, %c0_i32_0 : i32, i32
  }
  func.func @transform_7(%arg0: i32) -> (i32, i32, i32) {
    %c0_i32 = arith.constant 0 : i32
    %c0_i32_0 = arith.constant 0 : i32
    %c0_i32_1 = arith.constant 0 : i32
    return %arg0, %c0_i32, %c0_i32_0 : i32, i32, i32
  }
}

module attributes {stable_mosaic.version = 11 : i64} {
  func.func @_ff_block_kernel(%arg0: i32, %arg1: memref<1x8x32xf32, #tpu.memory_space<vmem>>, %arg2: memref<32x128xf32, #tpu.memory_space<vmem>>, %arg3: memref<1x128xf32, #tpu.memory_space<vmem>>, %arg4: memref<128x32xf32, #tpu.memory_space<vmem>>, %arg5: memref<1x32xf32, #tpu.memory_space<vmem>>, %arg6: memref<1x32xf32, #tpu.memory_space<vmem>>, %arg7: memref<1x32xf32, #tpu.memory_space<vmem>>, %arg8: memref<1x8x32xf32, #tpu.memory_space<vmem>>) attributes {dimension_semantics = [#tpu.dimension_semantics<parallel>], iteration_bounds = array<i64: 2>, scalar_prefetch = 0 : i64, scratch_operands = 0 : i64, tpu.core_type = #tpu.core_type<tc>, window_params = [{transform_indices = @transform_0, window_bounds = array<i64: 1, 8, 32>}, {pipeline_mode = #tpu.pipeline_mode<synchronous>, transform_indices = @transform_1, window_bounds = array<i64: 32, 128>}, {pipeline_mode = #tpu.pipeline_mode<synchronous>, transform_indices = @transform_2, window_bounds = array<i64: 1, 128>}, {pipeline_mode = #tpu.pipeline_mode<synchronous>, transform_indices = @transform_3, window_bounds = array<i64: 128, 32>}, {pipeline_mode = #tpu.pipeline_mode<synchronous>, transform_indices = @transform_4, window_bounds = array<i64: 1, 32>}, {pipeline_mode = #tpu.pipeline_mode<synchronous>, transform_indices = @transform_5, window_bounds = array<i64: 1, 32>}, {pipeline_mode = #tpu.pipeline_mode<synchronous>, transform_indices = @transform_6, window_bounds = array<i64: 1, 32>}, {transform_indices = @transform_7, window_bounds = array<i64: 1, 8, 32>}]} {
    %c0 = arith.constant 0 : index
    %c0_0 = arith.constant 0 : index
    %c0_1 = arith.constant 0 : index
    %0 = vector.load %arg1[%c0, %c0_0, %c0_1] : memref<1x8x32xf32, #tpu.memory_space<vmem>>, vector<1x8x32xf32>
    %1 = vector.shape_cast %0 : vector<1x8x32xf32> to vector<8x32xf32>
    %c0_2 = arith.constant 0 : index
    %c0_3 = arith.constant 0 : index
    %2 = vector.load %arg2[%c0_2, %c0_3] : memref<32x128xf32, #tpu.memory_space<vmem>>, vector<32x128xf32>
    %cst = arith.constant dense<0.000000e+00> : vector<8x128xf32>
    %3 = tpu.matmul %1, %2, %cst {dimension_numbers = #tpu.dot_dimension_numbers<[1], [0], [0], [1], [0, 0, 1, 1], [], []>} : vector<8x32xf32>, vector<32x128xf32>, vector<8x128xf32> -> vector<8x128xf32>
    %c0_4 = arith.constant 0 : index
    %c0_5 = arith.constant 0 : index
    %4 = vector.load %arg3[%c0_4, %c0_5] : memref<1x128xf32, #tpu.memory_space<vmem>>, vector<1x128xf32>
    %5 = vector.broadcast %4 : vector<1x128xf32> to vector<8x128xf32>
    %6 = arith.addf %3, %5 : vector<8x128xf32>
    %cst_6 = arith.constant 0.000000e+00 : f32
    %7 = vector.broadcast %cst_6 : f32 to vector<8x128xf32>
    %8 = arith.maximumf %6, %7 : vector<8x128xf32>
    %c0_7 = arith.constant 0 : index
    %c0_8 = arith.constant 0 : index
    %9 = vector.load %arg4[%c0_7, %c0_8] : memref<128x32xf32, #tpu.memory_space<vmem>>, vector<128x32xf32>
    %cst_9 = arith.constant dense<0.000000e+00> : vector<8x32xf32>
    %10 = tpu.matmul %8, %9, %cst_9 {dimension_numbers = #tpu.dot_dimension_numbers<[1], [0], [0], [1], [0, 0, 1, 1], [], []>} : vector<8x128xf32>, vector<128x32xf32>, vector<8x32xf32> -> vector<8x32xf32>
    %c0_10 = arith.constant 0 : index
    %c0_11 = arith.constant 0 : index
    %11 = vector.load %arg5[%c0_10, %c0_11] : memref<1x32xf32, #tpu.memory_space<vmem>>, vector<1x32xf32>
    %12 = vector.broadcast %11 : vector<1x32xf32> to vector<8x32xf32>
    %13 = arith.addf %10, %12 : vector<8x32xf32>
    %14 = arith.addf %13, %1 : vector<8x32xf32>
    %cst_12 = arith.constant dense<0.000000e+00> : vector<8xf32>
    %15 = vector.multi_reduction <add>, %14, %cst_12 [1] : vector<8x32xf32> to vector<8xf32>
    %16 = vector.shape_cast %15 : vector<8xf32> to vector<8x1xf32>
    %cst_13 = arith.constant 3.200000e+01 : f32
    %17 = vector.broadcast %cst_13 : f32 to vector<8x1xf32>
    %18 = arith.divf %16, %17 : vector<8x1xf32>
    %19 = vector.broadcast %18 : vector<8x1xf32> to vector<8x32xf32>
    %20 = arith.subf %14, %19 : vector<8x32xf32>
    %21 = arith.mulf %20, %20 : vector<8x32xf32>
    %cst_14 = arith.constant dense<0.000000e+00> : vector<8xf32>
    %22 = vector.multi_reduction <add>, %21, %cst_14 [1] : vector<8x32xf32> to vector<8xf32>
    %23 = vector.shape_cast %22 : vector<8xf32> to vector<8x1xf32>
    %cst_15 = arith.constant 3.200000e+01 : f32
    %24 = vector.broadcast %cst_15 : f32 to vector<8x1xf32>
    %25 = arith.divf %23, %24 : vector<8x1xf32>
    %cst_16 = arith.constant 9.99999974E-6 : f32
    %26 = vector.broadcast %cst_16 : f32 to vector<8x1xf32>
    %27 = arith.addf %25, %26 : vector<8x1xf32>
    %28 = math.rsqrt %27 : vector<8x1xf32>
    %29 = vector.broadcast %28 : vector<8x1xf32> to vector<8x32xf32>
    %30 = arith.mulf %20, %29 : vector<8x32xf32>
    %c0_17 = arith.constant 0 : index
    %c0_18 = arith.constant 0 : index
    %31 = vector.load %arg6[%c0_17, %c0_18] : memref<1x32xf32, #tpu.memory_space<vmem>>, vector<1x32xf32>
    %32 = vector.broadcast %31 : vector<1x32xf32> to vector<8x32xf32>
    %33 = arith.mulf %30, %32 : vector<8x32xf32>
    %c0_19 = arith.constant 0 : index
    %c0_20 = arith.constant 0 : index
    %34 = vector.load %arg7[%c0_19, %c0_20] : memref<1x32xf32, #tpu.memory_space<vmem>>, vector<1x32xf32>
    %35 = vector.broadcast %34 : vector<1x32xf32> to vector<8x32xf32>
    %36 = arith.addf %33, %35 : vector<8x32xf32>
    %c0_21 = arith.constant 0 : index
    %c0_22 = arith.constant 0 : index
    %c0_23 = arith.constant 0 : index
    %37 = vector.load %arg8[%c0_21, %c0_22, %c0_23] : memref<1x8x32xf32, #tpu.memory_space<vmem>>, vector<1x8x32xf32>
    %38 = vector.shape_cast %37 : vector<1x8x32xf32> to vector<8x32xf32>
    %39 = vector.shape_cast %36 : vector<8x32xf32> to vector<1x8x32xf32>
    tpu.vector_store %arg8[%c0_21, %c0_22, %c0_23], %39 {strides = array<i32>} : memref<1x8x32xf32, #tpu.memory_space<vmem>>, vector<1x8x32xf32>,
    return
  }
  func.func @transform_0(%arg0: i32) -> (i32, i32, i32) {
    %c0_i32 = arith.constant 0 : i32
    %c0_i32_0 = arith.constant 0 : i32
    %c0_i32_1 = arith.constant 0 : i32
    return %arg0, %c0_i32, %c0_i32_0 : i32, i32, i32
  }
  func.func @transform_1(%arg0: i32) -> (i32, i32) {
    %c0_i32 = arith.constant 0 : i32
    %c0_i32_0 = arith.constant 0 : i32
    %c0_i32_1 = arith.constant 0 : i32
    return %c0_i32, %c0_i32_0 : i32, i32
  }
  func.func @transform_2(%arg0: i32) -> (i32, i32) {
    %c0_i32 = arith.constant 0 : i32
    %c0_i32_0 = arith.constant 0 : i32
    %c0_i32_1 = arith.constant 0 : i32
    return %c0_i32, %c0_i32_0 : i32, i32
  }
  func.func @transform_3(%arg0: i32) -> (i32, i32) {
    %c0_i32 = arith.constant 0 : i32
    %c0_i32_0 = arith.constant 0 : i32
    %c0_i32_1 = arith.constant 0 : i32
    return %c0_i32, %c0_i32_0 : i32, i32
  }
  func.func @transform_4(%arg0: i32) -> (i32, i32) {
    %c0_i32 = arith.constant 0 : i32
    %c0_i32_0 = arith.constant 0 : i32
    %c0_i32_1 = arith.constant 0 : i32
    return %c0_i32, %c0_i32_0 : i32, i32
  }
  func.func @transform_5(%arg0: i32) -> (i32, i32) {
    %c0_i32 = arith.constant 0 : i32
    %c0_i32_0 = arith.constant 0 : i32
    %c0_i32_1 = arith.constant 0 : i32
    return %c0_i32, %c0_i32_0 : i32, i32
  }
  func.func @transform_6(%arg0: i32) -> (i32, i32) {
    %c0_i32 = arith.constant 0 : i32
    %c0_i32_0 = arith.constant 0 : i32
    %c0_i32_1 = arith.constant 0 : i32
    return %c0_i32, %c0_i32_0 : i32, i32
  }
  func.func @transform_7(%arg0: i32) -> (i32, i32, i32) {
    %c0_i32 = arith.constant 0 : i32
    %c0_i32_0 = arith.constant 0 : i32
    %c0_i32_1 = arith.constant 0 : i32
    return %arg0, %c0_i32, %c0_i32_0 : i32, i32, i32
  }
}

module attributes {stable_mosaic.version = 11 : i64} {
  func.func @_attn_block_kernel(%arg0: i32, %arg1: memref<1x8x32xf32, #tpu.memory_space<vmem>>, %arg2: memref<1x8x32xf32, #tpu.memory_space<vmem>>, %arg3: memref<32x96xf32, #tpu.memory_space<vmem>>, %arg4: memref<1x96xf32, #tpu.memory_space<vmem>>, %arg5: memref<32x32xf32, #tpu.memory_space<vmem>>, %arg6: memref<1x32xf32, #tpu.memory_space<vmem>>, %arg7: memref<1x8x8xf32, #tpu.memory_space<vmem>>, %arg8: memref<1x32xf32, #tpu.memory_space<vmem>>, %arg9: memref<1x32xf32, #tpu.memory_space<vmem>>, %arg10: memref<1x8x32xf32, #tpu.memory_space<vmem>>, %arg11: memref<8x32xf32, #tpu.memory_space<vmem>>) attributes {dimension_semantics = [#tpu.dimension_semantics<parallel>], iteration_bounds = array<i64: 2>, scalar_prefetch = 0 : i64, scratch_operands = 1 : i64, tpu.core_type = #tpu.core_type<tc>, window_params = [{transform_indices = @transform_0, window_bounds = array<i64: 1, 8, 32>}, {transform_indices = @transform_1, window_bounds = array<i64: 1, 8, 32>}, {pipeline_mode = #tpu.pipeline_mode<synchronous>, transform_indices = @transform_2, window_bounds = array<i64: 32, 96>}, {pipeline_mode = #tpu.pipeline_mode<synchronous>, transform_indices = @transform_3, window_bounds = array<i64: 1, 96>}, {pipeline_mode = #tpu.pipeline_mode<synchronous>, transform_indices = @transform_4, window_bounds = array<i64: 32, 32>}, {pipeline_mode = #tpu.pipeline_mode<synchronous>, transform_indices = @transform_5, window_bounds = array<i64: 1, 32>}, {transform_indices = @transform_6, window_bounds = array<i64: 1, 8, 8>}, {pipeline_mode = #tpu.pipeline_mode<synchronous>, transform_indices = @transform_7, window_bounds = array<i64: 1, 32>}, {pipeline_mode = #tpu.pipeline_mode<synchronous>, transform_indices = @transform_8, window_bounds = array<i64: 1, 32>}, {transform_indices = @transform_9, window_bounds = array<i64: 1, 8, 32>}]} {
    %c0 = arith.constant 0 : index
    %c0_0 = arith.constant 0 : index
    %c0_1 = arith.constant 0 : index
    %0 = vector.load %arg1[%c0, %c0_0, %c0_1] : memref<1x8x32xf32, #tpu.memory_space<vmem>>, vector<1x8x32xf32>
    %1 = vector.shape_cast %0 : vector<1x8x32xf32> to vector<8x32xf32>
    %c0_2 = arith.constant 0 : index
    %c0_3 = arith.constant 0 : index
    %c0_4 = arith.constant 0 : index
    %2 = vector.load %arg2[%c0_2, %c0_3, %c0_4] : memref<1x8x32xf32, #tpu.memory_space<vmem>>, vector<1x8x32xf32>
    %3 = vector.shape_cast %2 : vector<1x8x32xf32> to vector<8x32xf32>
    %c0_5 = arith.constant 0 : index
    %c0_6 = arith.constant 0 : index
    %4 = vector.load %arg3[%c0_5, %c0_6] : memref<32x96xf32, #tpu.memory_space<vmem>>, vector<32x96xf32>
    %c0_7 = arith.constant 0 : index
    %c0_8 = arith.constant 0 : index
    %5 = vector.load %arg4[%c0_7, %c0_8] : memref<1x96xf32, #tpu.memory_space<vmem>>, vector<1x96xf32>
    %c0_9 = arith.constant 0 : index
    %c0_10 = arith.constant 0 : index
    %c0_11 = arith.constant 0 : index
    %6 = vector.load %arg7[%c0_9, %c0_10, %c0_11] : memref<1x8x8xf32, #tpu.memory_space<vmem>>, vector<1x8x8xf32>
    %7 = vector.shape_cast %6 : vector<1x8x8xf32> to vector<8x8xf32>
    %8 = vector.extract_strided_slice %4 {offsets = [0, 0], sizes = [32, 32], strides = [1, 1]} : vector<32x96xf32> to vector<32x32xf32>
    %cst = arith.constant dense<0.000000e+00> : vector<8x32xf32>
    %9 = tpu.matmul %1, %8, %cst {dimension_numbers = #tpu.dot_dimension_numbers<[1], [0], [0], [1], [0, 0, 1, 1], [], []>} : vector<8x32xf32>, vector<32x32xf32>, vector<8x32xf32> -> vector<8x32xf32>
    %10 = vector.extract_strided_slice %5 {offsets = [0, 0], sizes = [1, 32], strides = [1, 1]} : vector<1x96xf32> to vector<1x32xf32>
    %11 = vector.broadcast %10 : vector<1x32xf32> to vector<8x32xf32>
    %12 = arith.addf %9, %11 : vector<8x32xf32>
    %13 = vector.extract_strided_slice %4 {offsets = [0, 32], sizes = [32, 64], strides = [1, 1]} : vector<32x96xf32> to vector<32x64xf32>
    %cst_12 = arith.constant dense<0.000000e+00> : vector<8x64xf32>
    %14 = tpu.matmul %3, %13, %cst_12 {dimension_numbers = #tpu.dot_dimension_numbers<[1], [0], [0], [1], [0, 0, 1, 1], [], []>} : vector<8x32xf32>, vector<32x64xf32>, vector<8x64xf32> -> vector<8x64xf32>
    %15 = vector.extract_strided_slice %5 {offsets = [0, 32], sizes = [1, 64], strides = [1, 1]} : vector<1x96xf32> to vector<1x64xf32>
    %16 = vector.broadcast %15 : vector<1x64xf32> to vector<8x64xf32>
    %17 = arith.addf %14, %16 : vector<8x64xf32>
    %18 = vector.extract_strided_slice %17 {offsets = [0, 0], sizes = [8, 32], strides = [1, 1]} : vector<8x64xf32> to vector<8x32xf32>
    %19 = vector.extract_strided_slice %17 {offsets = [0, 32], sizes = [8, 32], strides = [1, 1]} : vector<8x64xf32> to vector<8x32xf32>
    %20 = vector.extract_strided_slice %12 {offsets = [0, 0], sizes = [8, 8], strides = [1, 1]} : vector<8x32xf32> to vector<8x8xf32>
    %21 = vector.extract_strided_slice %18 {offsets = [0, 0], sizes = [8, 8], strides = [1, 1]} : vector<8x32xf32> to vector<8x8xf32>
    %22 = vector.extract_strided_slice %19 {offsets = [0, 0], sizes = [8, 8], strides = [1, 1]} : vector<8x32xf32> to vector<8x8xf32>
    %cst_13 = arith.constant dense<0.000000e+00> : vector<8x8xf32>
    %23 = tpu.matmul %20, %21, %cst_13 {dimension_numbers = #tpu.dot_dimension_numbers<[1], [1], [0], [0], [0, 0, 1, 0], [], []>} : vector<8x8xf32>, vector<8x8xf32>, vector<8x8xf32> -> vector<8x8xf32>
    %cst_14 = arith.constant 0.353553385 : f32
    %24 = vector.broadcast %cst_14 : f32 to vector<8x8xf32>
    %25 = arith.mulf %23, %24 : vector<8x8xf32>
    %26 = arith.minimumf %25, %7 : vector<8x8xf32>
    %cst_15 = arith.constant dense<0xFF800000> : vector<8xf32>
    %27 = vector.multi_reduction <maximumf>, %26, %cst_15 [1] : vector<8x8xf32> to vector<8xf32>
    %28 = vector.shape_cast %27 : vector<8xf32> to vector<8x1xf32>
    %29 = vector.broadcast %28 : vector<8x1xf32> to vector<8x8xf32>
    %30 = arith.subf %26, %29 : vector<8x8xf32>
    %31 = math.exp %30 : vector<8x8xf32>
    %cst_16 = arith.constant dense<0.000000e+00> : vector<8xf32>
    %32 = vector.multi_reduction <add>, %31, %cst_16 [1] : vector<8x8xf32> to vector<8xf32>
    %33 = vector.shape_cast %32 : vector<8xf32> to vector<8x1xf32>
    %34 = tpu.reciprocal %33 {approx = true} : vector<8x1xf32> -> vector<8x1xf32>
    %35 = vector.broadcast %34 : vector<8x1xf32> to vector<8x8xf32>
    %36 = arith.mulf %31, %35 : vector<8x8xf32>
    %cst_17 = arith.constant dense<0.000000e+00> : vector<8x8xf32>
    %37 = tpu.matmul %36, %22, %cst_17 {dimension_numbers = #tpu.dot_dimension_numbers<[1], [0], [0], [1], [0, 0, 1, 1], [], []>} : vector<8x8xf32>, vector<8x8xf32>, vector<8x8xf32> -> vector<8x8xf32>
    %c0_18 = arith.constant 0 : index
    %c0_19 = arith.constant 0 : index
    %38 = vector.load %arg11[%c0_18, %c0_19] : memref<8x32xf32, #tpu.memory_space<vmem>>, vector<8x8xf32>
    tpu.vector_store %arg11[%c0_18, %c0_19], %37 {strides = array<i32>} : memref<8x32xf32, #tpu.memory_space<vmem>>, vector<8x8xf32>,
    %39 = vector.extract_strided_slice %12 {offsets = [0, 8], sizes = [8, 8], strides = [1, 1]} : vector<8x32xf32> to vector<8x8xf32>
    %40 = vector.extract_strided_slice %18 {offsets = [0, 8], sizes = [8, 8], strides = [1, 1]} : vector<8x32xf32> to vector<8x8xf32>
    %41 = vector.extract_strided_slice %19 {offsets = [0, 8], sizes = [8, 8], strides = [1, 1]} : vector<8x32xf32> to vector<8x8xf32>
    %cst_20 = arith.constant dense<0.000000e+00> : vector<8x8xf32>
    %42 = tpu.matmul %39, %40, %cst_20 {dimension_numbers = #tpu.dot_dimension_numbers<[1], [1], [0], [0], [0, 0, 1, 0], [], []>} : vector<8x8xf32>, vector<8x8xf32>, vector<8x8xf32> -> vector<8x8xf32>
    %cst_21 = arith.constant 0.353553385 : f32
    %43 = vector.broadcast %cst_21 : f32 to vector<8x8xf32>
    %44 = arith.mulf %42, %43 : vector<8x8xf32>
    %45 = arith.minimumf %44, %7 : vector<8x8xf32>
    %cst_22 = arith.constant dense<0xFF800000> : vector<8xf32>
    %46 = vector.multi_reduction <maximumf>, %45, %cst_22 [1] : vector<8x8xf32> to vector<8xf32>
    %47 = vector.shape_cast %46 : vector<8xf32> to vector<8x1xf32>
    %48 = vector.broadcast %47 : vector<8x1xf32> to vector<8x8xf32>
    %49 = arith.subf %45, %48 : vector<8x8xf32>
    %50 = math.exp %49 : vector<8x8xf32>
    %cst_23 = arith.constant dense<0.000000e+00> : vector<8xf32>
    %51 = vector.multi_reduction <add>, %50, %cst_23 [1] : vector<8x8xf32> to vector<8xf32>
    %52 = vector.shape_cast %51 : vector<8xf32> to vector<8x1xf32>
    %53 = tpu.reciprocal %52 {approx = true} : vector<8x1xf32> -> vector<8x1xf32>
    %54 = vector.broadcast %53 : vector<8x1xf32> to vector<8x8xf32>
    %55 = arith.mulf %50, %54 : vector<8x8xf32>
    %cst_24 = arith.constant dense<0.000000e+00> : vector<8x8xf32>
    %56 = tpu.matmul %55, %41, %cst_24 {dimension_numbers = #tpu.dot_dimension_numbers<[1], [0], [0], [1], [0, 0, 1, 1], [], []>} : vector<8x8xf32>, vector<8x8xf32>, vector<8x8xf32> -> vector<8x8xf32>
    %c0_25 = arith.constant 0 : index
    %c8 = arith.constant 8 : index
    %57 = vector.load %arg11[%c0_25, %c8] : memref<8x32xf32, #tpu.memory_space<vmem>>, vector<8x8xf32>
    tpu.vector_store %arg11[%c0_25, %c8], %56 {strides = array<i32>} : memref<8x32xf32, #tpu.memory_space<vmem>>, vector<8x8xf32>,
    %58 = vector.extract_strided_slice %12 {offsets = [0, 16], sizes = [8, 8], strides = [1, 1]} : vector<8x32xf32> to vector<8x8xf32>
    %59 = vector.extract_strided_slice %18 {offsets = [0, 16], sizes = [8, 8], strides = [1, 1]} : vector<8x32xf32> to vector<8x8xf32>
    %60 = vector.extract_strided_slice %19 {offsets = [0, 16], sizes = [8, 8], strides = [1, 1]} : vector<8x32xf32> to vector<8x8xf32>
    %cst_26 = arith.constant dense<0.000000e+00> : vector<8x8xf32>
    %61 = tpu.matmul %58, %59, %cst_26 {dimension_numbers = #tpu.dot_dimension_numbers<[1], [1], [0], [0], [0, 0, 1, 0], [], []>} : vector<8x8xf32>, vector<8x8xf32>, vector<8x8xf32> -> vector<8x8xf32>
    %cst_27 = arith.constant 0.353553385 : f32
    %62 = vector.broadcast %cst_27 : f32 to vector<8x8xf32>
    %63 = arith.mulf %61, %62 : vector<8x8xf32>
    %64 = arith.minimumf %63, %7 : vector<8x8xf32>
    %cst_28 = arith.constant dense<0xFF800000> : vector<8xf32>
    %65 = vector.multi_reduction <maximumf>, %64, %cst_28 [1] : vector<8x8xf32> to vector<8xf32>
    %66 = vector.shape_cast %65 : vector<8xf32> to vector<8x1xf32>
    %67 = vector.broadcast %66 : vector<8x1xf32> to vector<8x8xf32>
    %68 = arith.subf %64, %67 : vector<8x8xf32>
    %69 = math.exp %68 : vector<8x8xf32>
    %cst_29 = arith.constant dense<0.000000e+00> : vector<8xf32>
    %70 = vector.multi_reduction <add>, %69, %cst_29 [1] : vector<8x8xf32> to vector<8xf32>
    %71 = vector.shape_cast %70 : vector<8xf32> to vector<8x1xf32>
    %72 = tpu.reciprocal %71 {approx = true} : vector<8x1xf32> -> vector<8x1xf32>
    %73 = vector.broadcast %72 : vector<8x1xf32> to vector<8x8xf32>
    %74 = arith.mulf %69, %73 : vector<8x8xf32>
    %cst_30 = arith.constant dense<0.000000e+00> : vector<8x8xf32>
    %75 = tpu.matmul %74, %60, %cst_30 {dimension_numbers = #tpu.dot_dimension_numbers<[1], [0], [0], [1], [0, 0, 1, 1], [], []>} : vector<8x8xf32>, vector<8x8xf32>, vector<8x8xf32> -> vector<8x8xf32>
    %c0_31 = arith.constant 0 : index
    %c16 = arith.constant 16 : index
    %76 = vector.load %arg11[%c0_31, %c16] : memref<8x32xf32, #tpu.memory_space<vmem>>, vector<8x8xf32>
    tpu.vector_store %arg11[%c0_31, %c16], %75 {strides = array<i32>} : memref<8x32xf32, #tpu.memory_space<vmem>>, vector<8x8xf32>,
    %77 = vector.extract_strided_slice %12 {offsets = [0, 24], sizes = [8, 8], strides = [1, 1]} : vector<8x32xf32> to vector<8x8xf32>
    %78 = vector.extract_strided_slice %18 {offsets = [0, 24], sizes = [8, 8], strides = [1, 1]} : vector<8x32xf32> to vector<8x8xf32>
    %79 = vector.extract_strided_slice %19 {offsets = [0, 24], sizes = [8, 8], strides = [1, 1]} : vector<8x32xf32> to vector<8x8xf32>
    %cst_32 = arith.constant dense<0.000000e+00> : vector<8x8xf32>
    %80 = tpu.matmul %77, %78, %cst_32 {dimension_numbers = #tpu.dot_dimension_numbers<[1], [1], [0], [0], [0, 0, 1, 0], [], []>} : vector<8x8xf32>, vector<8x8xf32>, vector<8x8xf32> -> vector<8x8xf32>
    %cst_33 = arith.constant 0.353553385 : f32
    %81 = vector.broadcast %cst_33 : f32 to vector<8x8xf32>
    %82 = arith.mulf %80, %81 : vector<8x8xf32>
    %83 = arith.minimumf %82, %7 : vector<8x8xf32>
    %cst_34 = arith.constant dense<0xFF800000> : vector<8xf32>
    %84 = vector.multi_reduction <maximumf>, %83, %cst_34 [1] : vector<8x8xf32> to vector<8xf32>
    %85 = vector.shape_cast %84 : vector<8xf32> to vector<8x1xf32>
    %86 = vector.broadcast %85 : vector<8x1xf32> to vector<8x8xf32>
    %87 = arith.subf %83, %86 : vector<8x8xf32>
    %88 = math.exp %87 : vector<8x8xf32>
    %cst_35 = arith.constant dense<0.000000e+00> : vector<8xf32>
    %89 = vector.multi_reduction <add>, %88, %cst_35 [1] : vector<8x8xf32> to vector<8xf32>
    %90 = vector.shape_cast %89 : vector<8xf32> to vector<8x1xf32>
    %91 = tpu.reciprocal %90 {approx = true} : vector<8x1xf32> -> vector<8x1xf32>
    %92 = vector.broadcast %91 : vector<8x1xf32> to vector<8x8xf32>
    %93 = arith.mulf %88, %92 : vector<8x8xf32>
    %cst_36 = arith.constant dense<0.000000e+00> : vector<8x8xf32>
    %94 = tpu.matmul %93, %79, %cst_36 {dimension_numbers = #tpu.dot_dimension_numbers<[1], [0], [0], [1], [0, 0, 1, 1], [], []>} : vector<8x8xf32>, vector<8x8xf32>, vector<8x8xf32> -> vector<8x8xf32>
    %c0_37 = arith.constant 0 : index
    %c24 = arith.constant 24 : index
    %95 = vector.load %arg11[%c0_37, %c24] : memref<8x32xf32, #tpu.memory_space<vmem>>, vector<8x8xf32>
    tpu.vector_store %arg11[%c0_37, %c24], %94 {strides = array<i32>} : memref<8x32xf32, #tpu.memory_space<vmem>>, vector<8x8xf32>,
    %c0_38 = arith.constant 0 : index
    %c0_39 = arith.constant 0 : index
    %96 = vector.load %arg11[%c0_38, %c0_39] : memref<8x32xf32, #tpu.memory_space<vmem>>, vector<8x32xf32>
    %c0_40 = arith.constant 0 : index
    %c0_41 = arith.constant 0 : index
    %97 = vector.load %arg5[%c0_40, %c0_41] : memref<32x32xf32, #tpu.memory_space<vmem>>, vector<32x32xf32>
    %cst_42 = arith.constant dense<0.000000e+00> : vector<8x32xf32>
    %98 = tpu.matmul %96, %97, %cst_42 {dimension_numbers = #tpu.dot_dimension_numbers<[1], [0], [0], [1], [0, 0, 1, 1], [], []>} : vector<8x32xf32>, vector<32x32xf32>, vector<8x32xf32> -> vector<8x32xf32>
    %c0_43 = arith.constant 0 : index
    %c0_44 = arith.constant 0 : index
    %99 = vector.load %arg6[%c0_43, %c0_44] : memref<1x32xf32, #tpu.memory_space<vmem>>, vector<1x32xf32>
    %100 = vector.broadcast %99 : vector<1x32xf32> to vector<8x32xf32>
    %101 = arith.addf %98, %100 : vector<8x32xf32>
    %102 = arith.addf %101, %1 : vector<8x32xf32>
    %cst_45 = arith.constant dense<0.000000e+00> : vector<8xf32>
    %103 = vector.multi_reduction <add>, %102, %cst_45 [1] : vector<8x32xf32> to vector<8xf32>
    %104 = vector.shape_cast %103 : vector<8xf32> to vector<8x1xf32>
    %cst_46 = arith.constant 3.200000e+01 : f32
    %105 = vector.broadcast %cst_46 : f32 to vector<8x1xf32>
    %106 = arith.divf %104, %105 : vector<8x1xf32>
    %107 = vector.broadcast %106 : vector<8x1xf32> to vector<8x32xf32>
    %108 = arith.subf %102, %107 : vector<8x32xf32>
    %109 = arith.mulf %108, %108 : vector<8x32xf32>
    %cst_47 = arith.constant dense<0.000000e+00> : vector<8xf32>
    %110 = vector.multi_reduction <add>, %109, %cst_47 [1] : vector<8x32xf32> to vector<8xf32>
    %111 = vector.shape_cast %110 : vector<8xf32> to vector<8x1xf32>
    %cst_48 = arith.constant 3.200000e+01 : f32
    %112 = vector.broadcast %cst_48 : f32 to vector<8x1xf32>
    %113 = arith.divf %111, %112 : vector<8x1xf32>
    %cst_49 = arith.constant 9.99999974E-6 : f32
    %114 = vector.broadcast %cst_49 : f32 to vector<8x1xf32>
    %115 = arith.addf %113, %114 : vector<8x1xf32>
    %116 = math.rsqrt %115 : vector<8x1xf32>
    %117 = vector.broadcast %116 : vector<8x1xf32> to vector<8x32xf32>
    %118 = arith.mulf %108, %117 : vector<8x32xf32>
    %c0_50 = arith.constant 0 : index
    %c0_51 = arith.constant 0 : index
    %119 = vector.load %arg8[%c0_50, %c0_51] : memref<1x32xf32, #tpu.memory_space<vmem>>, vector<1x32xf32>
    %120 = vector.broadcast %119 : vector<1x32xf32> to vector<8x32xf32>
    %121 = arith.mulf %118, %120 : vector<8x32xf32>
    %c0_52 = arith.constant 0 : index
    %c0_53 = arith.constant 0 : index
    %122 = vector.load %arg9[%c0_52, %c0_53] : memref<1x32xf32, #tpu.memory_space<vmem>>, vector<1x32xf32>
    %123 = vector.broadcast %122 : vector<1x32xf32> to vector<8x32xf32>
    %124 = arith.addf %121, %123 : vector<8x32xf32>
    %c0_54 = arith.constant 0 : index
    %c0_55 = arith.constant 0 : index
    %c0_56 = arith.constant 0 : index
    %125 = vector.load %arg10[%c0_54, %c0_55, %c0_56] : memref<1x8x32xf32, #tpu.memory_space<vmem>>, vector<1x8x32xf32>
    %126 = vector.shape_cast %125 : vector<1x8x32xf32> to vector<8x32xf32>
    %127 = vector.shape_cast %124 : vector<8x32xf32> to vector<1x8x32xf32>
    tpu.vector_store %arg10[%c0_54, %c0_55, %c0_56], %127 {strides = array<i32>} : memref<1x8x32xf32, #tpu.memory_space<vmem>>, vector<1x8x32xf32>,
    return
  }
  func.func @transform_0(%arg0: i32) -> (i32, i32, i32) {
    %c0_i32 = arith.constant 0 : i32
    %c0_i32_0 = arith.constant 0 : i32
    %c0_i32_1 = arith.constant 0 : i32
    return %arg0, %c0_i32, %c0_i32_0 : i32, i32, i32
  }
  func.func @transform_1(%arg0: i32) -> (i32, i32, i32) {
    %c0_i32 = arith.constant 0 : i32
    %c0_i32_0 = arith.constant 0 : i32
    %c0_i32_1 = arith.constant 0 : i32
    return %arg0, %c0_i32, %c0_i32_0 : i32, i32, i32
  }
  func.func @transform_2(%arg0: i32) -> (i32, i32) {
    %c0_i32 = arith.constant 0 : i32
    %c0_i32_0 = arith.constant 0 : i32
    %c0_i32_1 = arith.constant 0 : i32
    return %c0_i32, %c0_i32_0 : i32, i32
  }
  func.func @transform_3(%arg0: i32) -> (i32, i32) {
    %c0_i32 = arith.constant 0 : i32
    %c0_i32_0 = arith.constant 0 : i32
    %c0_i32_1 = arith.constant 0 : i32
    return %c0_i32, %c0_i32_0 : i32, i32
  }
  func.func @transform_4(%arg0: i32) -> (i32, i32) {
    %c0_i32 = arith.constant 0 : i32
    %c0_i32_0 = arith.constant 0 : i32
    %c0_i32_1 = arith.constant 0 : i32
    return %c0_i32, %c0_i32_0 : i32, i32
  }
  func.func @transform_5(%arg0: i32) -> (i32, i32) {
    %c0_i32 = arith.constant 0 : i32
    %c0_i32_0 = arith.constant 0 : i32
    %c0_i32_1 = arith.constant 0 : i32
    return %c0_i32, %c0_i32_0 : i32, i32
  }
  func.func @transform_6(%arg0: i32) -> (i32, i32, i32) {
    %c0_i32 = arith.constant 0 : i32
    %c0_i32_0 = arith.constant 0 : i32
    %c0_i32_1 = arith.constant 0 : i32
    return %arg0, %c0_i32, %c0_i32_0 : i32, i32, i32
  }
  func.func @transform_7(%arg0: i32) -> (i32, i32) {
    %c0_i32 = arith.constant 0 : i32
    %c0_i32_0 = arith.constant 0 : i32
    %c0_i32_1 = arith.constant 0 : i32
    return %c0_i32, %c0_i32_0 : i32, i32
  }
  func.func @transform_8(%arg0: i32) -> (i32, i32) {
    %c0_i32 = arith.constant 0 : i32
    %c0_i32_0 = arith.constant 0 : i32
    %c0_i32_1 = arith.constant 0 : i32
    return %c0_i32, %c0_i32_0 : i32, i32
  }
  func.func @transform_9(%arg0: i32) -> (i32, i32, i32) {
    %c0_i32 = arith.constant 0 : i32
    %c0_i32_0 = arith.constant 0 : i32
    %c0_i32_1 = arith.constant 0 : i32
    return %arg0, %c0_i32, %c0_i32_0 : i32, i32, i32
  }
}

</mosaic_0001>

<bundles_post_ra>
// kernel: transformer_forward.19
= control target key start
LH: loop header
LB: loop body
LE: loop exit
PB: predicated region body
PF: predicated region fallthrough
CT: control target
= control target key end

     0   :  { %12 = vsyncpa [#allocation3], 0  ;;  %s977_s0 = inlined_call_operand.vmem [shape: f32[2,8,32], index: 0, kind: input, shape index: {}]   ;;  %s978_s1 = inlined_call_operand.vmem [shape: f32[32,128], index: 1, kind: input, shape index: {}]   ;;  %s979_s2 = inlined_call_operand.vmem [shape: f32[1,128], index: 2, kind: input, shape index: {}]   ;;  %s980_s3 = inlined_call_operand.vmem [shape: f32[128,32], index: 3, kind: input, shape index: {}]   ;;  %s981_s4 = inlined_call_operand.vmem [shape: f32[1,32], index: 4, kind: input, shape index: {}]   ;;  %s982_s5 = inlined_call_operand.vmem [shape: f32[1,32], index: 5, kind: input, shape index: {}]   ;;  %s983_s6 = inlined_call_operand.vmem [shape: f32[1,32], index: 6, kind: input, shape index: {}]   ;;  %s984_s7 = inlined_call_operand.hbm [shape: f32[2,8,32], index: 7, kind: output, shape index: {}]  }
   0x1   :  { %14 = vsyncpa [#allocation3 + $0x1], 0  ;;  %s790_s24 = smov 0   ;;  %s792_s25 = smov 0  }
   0x2   :  { %s794_s26 = smov 0   ;;  %s796_s27 = smov 0  }
   0x3 LB: > { %s811_s28 = sadd.s32 4294967295, %s745_s27   ;;  %s559_s29 = sadd.s32 4294967294, %s745_s27   ;;  %s745_s27 = sphi %s796_s27, %s990_s27   ;;  %s741_s26 = sphi %s794_s26, %s989_s26   ;;  %s737_s25 = sphi %s792_s25, %s988_s25   ;;  %s733_s24 = sphi %s790_s24, %s987_s24  }
   0x4   : > { %s815_s30 = sadd.s32 1, %s745_s27   ;;  %s179_s8 = sadd.s32 1, %s741_s26 }
   0x5   : > { %s176_s9 = ssub.s32 %s745_s27, %s815_s30  ;;  %p189_p0 = scmp.ne.s32.totalorder %s741_s26, %s737_s25 }
   0x6   : > { %p177_p1 = scmp.eq.s32.totalorder %s176_s9, 0  ;;  %p190_p2 = scmp.eq.s32.totalorder %s811_s28, 1 }
   0x7   : > { %p195_p3 = scmp.ne.s32.totalorder %s737_s25, %s733_s24  ;;  %p196_p4 = scmp.eq.s32.totalorder %s559_s29, 1 }
   0x8   : > { %s826_s10 = scalar_select %p177_p1, %s741_s26, %s179_s8  }
   0x9   : > { %p828_p5 = por %p190_p2, %p189_p0  ;;  %p832_p6 = por %p196_p4, %p195_p3 }
   0xa   : > { %p562_p7 = scmp.ge.s32.totalorder %s745_s27, 1  ;;  %p239_p8 = scmp.lt.s32.totalorder %s745_s27, 3 }
   0xc   : > { %p240_p9 = pnand %p562_p7, %p239_p8 }
   0xd   : > { %p270_p10 = scmp.lt.s32.totalorder (!%p240_p9), %s811_s28, 1  ;;  %s267_s20 = sand.u32 (!%p240_p9), 1, %s737_s25  }
   0xe   : > { %243 = sbr.rel (%p240_p9) target bundleno = 743 (0x2e7), region = 48  ;;  %s563_s21 = sshll.u32 (!%p240_p9), %s267_s20, 3 }
   0xf   : > { %s571_s9 = sshll.u32 (!%p240_p9), %s811_s28, 7  ;;  %s269_s13 = scalar_lea.vmem (!%p240_p9), [#allocation2], %s563_s21 }
  0x10   : > { %s500_s14 = sshll.u32 (!%p240_p9), %s269_s13, 4  ;;  %s487_s18 = scalar_lea.sflag (!%p240_p9), [#allocation3], %s267_s20  ;;  %s501_s14 = int_to_ptr.vmem [resolvable:$true] %s500_s14 }
  0x11   : > { %s749_s22 = smov (!%p240_p9), [#allocation2]  }
  0x12   : > { %s689_s23 = sshll.u32 (!%p240_p9), %s749_s22, 4  ;;  %s690_s23 = int_to_ptr.vmem [resolvable:$false] %s689_s23 }
  0x13   : > { %v278_v0 = vld [vmem:[%s978_s1 + $0x18] sm:$0xff]  ;;  %v747_v1 = vmov 0.0   ;;  %v277_v2 = vld [vmem:[%s978_s1 + $0x10] sm:$0xff]  ;;  %vm748_vm0 = vmmov 0   ;;  %s271_s19 = scalar_select %p270_p10, %s811_s28, 1  ;;  %v276_v5 = vld [vmem:[%s978_s1 + $0x8] sm:$0xff] }
  0x14   : > { %596 = vmatprep.subr.mxu0 %v747_v1  ;;  %604 = vmatprep.mubr.msk.f32.mxu0 %vm748_vm0, %v747_v1  ;;  %v376_v3 = vld [vmem:[%s980_s3 + $0x78] sm:$0xff]  ;;  %v375_v4 = vld [vmem:[%s980_s3 + $0x70] sm:$0xff]  ;;  %v374_v6 = vld [vmem:[%s980_s3 + $0x68] sm:$0xff]  ;;  %vm286_vm1 = vcmask 261120   ;;  %s691_s28 = scalar_lea.vmem %s690_s23, 256  ;;  %p692_p0 = scmp.lt.s32.totalorder %s501_s14, %s690_s23 }
  0x15   : > { %597 = vmatpush3.msra.mxu0 %v278_v0  ;;  %607 = vmatprep.subr.mxu1 %v747_v1  ;;  %s564_s29 = sshll.u32 %s271_s19, 3  ;;  %v275_v7 = vld [vmem:[%s978_s1] sm:$0xff]  ;;  %v372_v10 = vld [vmem:[%s980_s3 + $0x58] sm:$0xff]  ;;  %v371_v11 = vld [vmem:[%s980_s3 + $0x50] sm:$0xff]  ;;  %s685_s19 = scalar_lea.vmem %s501_s14, 128 }
  0x16   : > { %598 = vmatprep.subr.mxu0 %v747_v1  ;;  %608 = vmatpush3.msra.mxu1 %v376_v3  ;;  %s273_s17 = scalar_lea.vmem %s977_s0, %s564_s29  ;;  %v373_v9 = vld [vmem:[%s980_s3 + $0x60] sm:$0xff]  ;;  %v370_v12 = vld [vmem:[%s980_s3 + $0x48] sm:$0xff]  ;;  %v368_v14 = vld [vmem:[%s980_s3 + $0x38] sm:$0xff]  ;;  %p686_p11 = scmp.ne.s32.totalorder %s501_s14, %s685_s19 }
  0x17   : > { %599 = vmatpush3.msra.mxu0 %v277_v2  ;;  %609 = vmatprep.subr.mxu1 %v747_v1  ;;  %v274_v8 = vld [vmem:[%s273_s17] sm:$0xff]  ;;  %v367_v15 = vld [vmem:[%s980_s3 + $0x30] sm:$0xff]  ;;  %v366_v16 = vld [vmem:[%s980_s3 + $0x28] sm:$0xff]  ;;  %s498_s17 = scalar_lea.hbm %s984_s7, %s571_s9  ;;  %p693_p1 = scmp.lt.s32.totalorder %s691_s28, %s685_s19 }
  0x18   : > { %600 = vmatprep.subr.mxu0 %v747_v1  ;;  %610 = vmatpush3.msra.mxu1 %v375_v4  ;;  %v369_v13 = vld [vmem:[%s980_s3 + $0x40] sm:$0xff]  ;;  %v364_v18 = vld [vmem:[%s980_s3 + $0x18] sm:$0xff]  ;;  %v363_v19 = vld [vmem:[%s980_s3 + $0x10] sm:$0xff]  ;;  %p687_p12 = pnand %p686_p11, %p828_p5 }
  0x19   : > { %601 = vmatpush3.msra.mxu0 %v276_v5  ;;  %611 = vmatprep.subr.mxu1 %v747_v1  ;;  %v365_v17 = vld [vmem:[%s980_s3 + $0x20] sm:$0xff]  ;;  %v362_v20 = vld [vmem:[%s980_s3 + $0x8] sm:$0xff]  ;;  %p694_p2 = por %p693_p1, %p692_p0 }
  0x1a   : > { %602 = vmatprep.subr.mxu0 %v747_v1  ;;  %612 = vmatpush3.msra.mxu1 %v374_v6  ;;  %v361_v21 = vld [vmem:[%s980_s3] sm:$0xff]  ;;  %p688_p13 = pneg %p687_p12 }
  0x1b   : > { %603 = vmatpush3.msra.mxu0 %v275_v7  ;;  %613 = vmatprep.subr.mxu1 %v747_v1  ;;  %v565_v22 = vld [vmem:[%s979_s2] ss:$0 sm:$0xff] }
  0x1c   : > { %605 = vmatmul.mubr.msk.f32.vlgmr.msra.gmra.mxu0 %vm286_vm1, %v274_v8  ;;  %614 = vmatpush3.msra.mxu1 %v373_v9  ;;  %v567_v27 = vld [vmem:[%s981_s4] ss:$0 sm:$0xff]  ;;  %p695_p3 = pnand %p694_p2, %p688_p13 }
  0x1d   : > { %615 = vmatprep.subr.mxu1 %v747_v1  ;;  %639 = vmatprep.mubr.msk.f32.mxu1 %vm748_vm0, %v747_v1  ;;  %v568_v42 = vld [vmem:[%s982_s5] ss:$0 sm:$0xff] }
  0x1e   : > { %616 = vmatpush3.msra.mxu1 %v372_v10  ;;  %v569_v44 = vld [vmem:[%s983_s6] ss:$0 sm:$0xff] }
  0x1f   : > { %617 = vmatprep.subr.mxu1 %v747_v1 }
  0x20   : > { %618 = vmatpush3.msra.mxu1 %v371_v11 }
  0x21   : > { %619 = vmatprep.subr.mxu1 %v747_v1 }
  0x22   : > { %620 = vmatpush3.msra.mxu1 %v370_v12 }
  0x23   : > { %621 = vmatprep.subr.mxu1 %v747_v1 }
  0x24   : > { %622 = vmatpush3.msra.mxu1 %v369_v13 }
  0x25   : > { %623 = vmatprep.subr.mxu1 %v747_v1 }
  0x26   : > { %624 = vmatpush3.msra.mxu1 %v368_v14 }
  0x27   : > { %625 = vmatprep.subr.mxu1 %v747_v1 }
  0x28   : > { %626 = vmatpush3.msra.mxu1 %v367_v15 }
  0x29   : > { %627 = vmatprep.subr.mxu1 %v747_v1 }
  0x2a   : > { %628 = vmatpush3.msra.mxu1 %v366_v16 }
  0x2b   : > { %629 = vmatprep.subr.mxu1 %v747_v1 }
  0x2c   : > { %630 = vmatpush3.msra.mxu1 %v365_v17 }
  0x2d   : > { %631 = vmatprep.subr.mxu1 %v747_v1 }
  0x2e   : > { %632 = vmatpush3.msra.mxu1 %v364_v18 }
  0x2f   : > { %633 = vmatprep.subr.mxu1 %v747_v1 }
  0x30   : > { %634 = vmatpush3.msra.mxu1 %v363_v19 }
  0x31   : > { %635 = vmatprep.subr.mxu1 %v747_v1 }
  0x32   : > { %636 = vmatpush3.msra.mxu1 %v362_v20 }
  0x33   : > { %637 = vmatprep.subr.mxu1 %v747_v1 }
  0x34   : > { %638 = vmatpush3.msra.mxu1 %v361_v21 }
  0xdc   : > { %v356_v23 = vpop.f32.mrf.mxu0 }
  0xdd   : > { %v357_v24 = vadd.f32 %v565_v22, %v356_v23 }
  0xde   : > { %v606_v25 = vpop.f32.mrf.mxu0 }
  0xdf   : > { %v360_v26 = vmax.f32 %v357_v24, 0.0 }
  0xe1   : > { %640 = vmatmul.mubr.f32.vlgmr.msra.gmra.mxu1 %v360_v26 }
 0x1a1   : > { %v450_v28 = vpop.f32.mrf.mxu1 }
 0x1a2   : > { %v451_v29 = vadd.f32 %v567_v27, %v450_v28 }
 0x1a3   : > { %v641_v30 = vpop.f32.mrf.mxu1 }
 0x1a4   : > { %v454_v31 = vadd.f32 %v451_v29, %v274_v8 }
 0x1a6   : > { %v455_v32 = vsel %vm286_vm1, %v454_v31, 0.0 }
 0x1a7   : > { %456 = vadd.xlane.f32.xlu0 %v455_v32 }
 0x230   : > { %v457_v33 = vpop.xlane.xlu0 %456 }
 0x231   : > { %v459_v34 = vmul.f32 0.03125, %v457_v33 }
 0x233   : > { %v460_v35 = vsub.f32 %v454_v31, %v459_v34 }
 0x235   : > { %v461_v36 = vmul.f32 %v460_v35, %v460_v35 }
 0x237   : > { %v462_v37 = vsel %vm286_vm1, %v461_v36, 0.0 }
 0x238   : > { %463 = vadd.xlane.f32.xlu0 %v462_v37 }
 0x2c1   : > { %v464_v38 = vpop.xlane.xlu0 %463 }
 0x2c2   : > { %v465_v39 = vmul.f32 0.03125, %v464_v38 }
 0x2c4   : > { %v466_v40 = vadd.f32 1e-05, %v465_v39 }
 0x2c6   : > { %683 = vrsqrt.f32 %v466_v40 }
 0x2d3   : > { %v684_v41 = vpop.eup %683 }
 0x2d4   : > { %v468_v43 = vmul.f32 %v684_v41, %v460_v35 }
 0x2d6   : > { %v476_v45 = vmul.f32 %v568_v42, %v468_v43 }
 0x2d8   : > { %v484_v46 = vadd.f32 %v569_v44, %v476_v45 }
 0x2da   : > { %485 = vst.msk [vmem:[%s269_s13] sm:$0xff] %vm286_vm1, %v484_v46 }
 0x2db   : > { %698 = shalt.err (!%p695_p3)
}
 0x2dc   : > { %s699_s21 = scalar_lea.hbm %s498_s17, 128  ;;  %s703_s8 = scalar_lea.hbm %s984_s7, 256 }
 0x2dd   : > { %p700_p4 = scmp.ne.s32.totalorder %s498_s17, %s699_s21  ;;  %p704_p9 = scmp.lt.s32.totalorder %s498_s17, %s984_s7 }
 0x2de   : > { %p705_p10 = scmp.lt.s32.totalorder %s703_s8, %s699_s21 }
 0x2df   : > { %p701_p7 = pnand %p700_p4, %p828_p5 }
 0x2e0   : > { %p706_p11 = por %p705_p10, %p704_p9 }
 0x2e1   : > { %p702_p8 = pneg %p701_p7 }
 0x2e3   : > { %p707_p12 = pnand %p706_p11, %p702_p8 }
 0x2e5   : > { %710 = shalt.err (!%p707_p12)
}
 0x2e6   : > { %642 = dma.vmem_to_hbm [thread:$0]  (%p828_p5), %s501_s14, 128, %s498_s17, %s487_s18  }
 0x2e7 PF: > { %p648_p13 = scmp.ge.s32.totalorder %s745_s27, 2  ;;  %s512_s15 = sand.u32 1, %s733_s24  }
 0x2e8   : > { %s513_s16 = scalar_lea.sflag [#allocation3], %s512_s15 }
 0x2e9   : > { %p645_p0 = pnand %p648_p13, %p832_p6 }
 0x2eb   : > { %p646_p1 = pneg %p645_p0 }
 0x2ed   : > { %728 = dma.done.wait (%p646_p1), %s513_s16, 128  }
 0x2ee   : > { %730 = vsyncadd (%p646_p1), %s513_s16, 4294967168  ;;  %p17_p2 = scmp.ge.s32.totalorder %s815_s30, 4   ;;  %s987_s24 = smov %s737_s25 }
 0x2ef   : > { %s988_s25 = smov %s741_s26  ;;  %s989_s26 = smov %s826_s10 }
 0x2f0   : > { %s990_s27 = smov %s815_s30  ;;  %19 = sbr.rel (!%p17_p2) target bundleno = 3 (0x3), region = 83 }
 0x2f5   :  { %518 = vsyncpa [#allocation3], 1 }
 0x2f6   :  { %520 = vsyncpa [#allocation3 + $0x1], 1 }

// kernel: transformer_forward.11
= control target key start
LH: loop header
LB: loop body
LE: loop exit
PB: predicated region body
PF: predicated region fallthrough
CT: control target
= control target key end

     0   :  { %s683_s24 = smov 0   ;;  %s807_s0 = inlined_call_operand.vmem [shape: f32[2,8,32], index: 0, kind: input, shape index: {}]   ;;  %s808_s1 = inlined_call_operand.vmem [shape: f32[32,128], index: 1, kind: input, shape index: {}]   ;;  %s809_s2 = inlined_call_operand.vmem [shape: f32[1,128], index: 2, kind: input, shape index: {}]   ;;  %s810_s3 = inlined_call_operand.vmem [shape: f32[128,32], index: 3, kind: input, shape index: {}]   ;;  %s811_s4 = inlined_call_operand.vmem [shape: f32[1,32], index: 4, kind: input, shape index: {}]   ;;  %s812_s5 = inlined_call_operand.vmem [shape: f32[1,32], index: 5, kind: input, shape index: {}]   ;;  %s813_s6 = inlined_call_operand.vmem [shape: f32[1,32], index: 6, kind: input, shape index: {}]   ;;  %s814_s7 = inlined_call_operand.vmem [shape: f32[2,8,32], index: 7, kind: output, shape index: {}]  }
   0x1 LB: > { %s539_s25 = sadd.s32 4294967295, %s639_s24   ;;  %p543_p0 = scmp.ge.s32.totalorder %s639_s24, 1  ;;  %s639_s24 = sphi %s683_s24, %s17_s24  }
   0x2   : > { %p236_p1 = scmp.lt.s32.totalorder %s639_s24, 3 }
   0x4   : > { %p237_p2 = pnand %p543_p0, %p236_p1 }
   0x5   : > { %p266_p3 = scmp.lt.s32.totalorder (!%p237_p2), %s539_s25, 1 }
   0x6   : > { %240 = sbr.rel (%p237_p2) target bundleno = 723 (0x2d3), region = 48 }
   0xb   : > { %v278_v0 = vld [vmem:[%s808_s1 + $0x18] sm:$0xff]  ;;  %v641_v1 = vmov 0.0   ;;  %v277_v2 = vld [vmem:[%s808_s1 + $0x10] sm:$0xff]  ;;  %vm642_vm0 = vmmov 0   ;;  %s816_s25 = smov (!%p266_p3, %s539_s25), 1  ;;  %v276_v5 = vld [vmem:[%s808_s1 + $0x8] sm:$0xff] }
   0xc   : > { %575 = vmatprep.subr.mxu0 %v641_v1  ;;  %583 = vmatprep.mubr.msk.f32.mxu0 %vm642_vm0, %v641_v1  ;;  %v376_v3 = vld [vmem:[%s810_s3 + $0x78] sm:$0xff]  ;;  %v375_v4 = vld [vmem:[%s810_s3 + $0x70] sm:$0xff]  ;;  %s544_s13 = sshll.u32 %s816_s25, 3  ;;  %v374_v6 = vld [vmem:[%s810_s3 + $0x68] sm:$0xff]  ;;  %vm286_vm1 = vcmask 261120  }
   0xd   : > { %576 = vmatpush3.msra.mxu0 %v278_v0  ;;  %586 = vmatprep.subr.mxu1 %v641_v1  ;;  %v275_v7 = vld [vmem:[%s808_s1] sm:$0xff]  ;;  %s269_s20 = scalar_lea.vmem %s807_s0, %s544_s13  ;;  %v372_v10 = vld [vmem:[%s810_s3 + $0x58] sm:$0xff]  ;;  %v371_v11 = vld [vmem:[%s810_s3 + $0x50] sm:$0xff]  ;;  %s273_s17 = scalar_lea.vmem %s814_s7, %s544_s13 }
   0xe   : > { %577 = vmatprep.subr.mxu0 %v641_v1  ;;  %587 = vmatpush3.msra.mxu1 %v376_v3  ;;  %v274_v8 = vld [vmem:[%s269_s20] sm:$0xff]  ;;  %v370_v12 = vld [vmem:[%s810_s3 + $0x48] sm:$0xff]  ;;  %v368_v14 = vld [vmem:[%s810_s3 + $0x38] sm:$0xff] }
   0xf   : > { %578 = vmatpush3.msra.mxu0 %v277_v2  ;;  %588 = vmatprep.subr.mxu1 %v641_v1  ;;  %v373_v9 = vld [vmem:[%s810_s3 + $0x60] sm:$0xff]  ;;  %v367_v15 = vld [vmem:[%s810_s3 + $0x30] sm:$0xff]  ;;  %v366_v16 = vld [vmem:[%s810_s3 + $0x28] sm:$0xff] }
  0x10   : > { %579 = vmatprep.subr.mxu0 %v641_v1  ;;  %589 = vmatpush3.msra.mxu1 %v375_v4  ;;  %v369_v13 = vld [vmem:[%s810_s3 + $0x40] sm:$0xff]  ;;  %v364_v18 = vld [vmem:[%s810_s3 + $0x18] sm:$0xff]  ;;  %v363_v19 = vld [vmem:[%s810_s3 + $0x10] sm:$0xff] }
  0x11   : > { %580 = vmatpush3.msra.mxu0 %v276_v5  ;;  %590 = vmatprep.subr.mxu1 %v641_v1  ;;  %v365_v17 = vld [vmem:[%s810_s3 + $0x20] sm:$0xff]  ;;  %v362_v20 = vld [vmem:[%s810_s3 + $0x8] sm:$0xff] }
  0x12   : > { %581 = vmatprep.subr.mxu0 %v641_v1  ;;  %591 = vmatpush3.msra.mxu1 %v374_v6  ;;  %v361_v21 = vld [vmem:[%s810_s3] sm:$0xff] }
  0x13   : > { %582 = vmatpush3.msra.mxu0 %v275_v7  ;;  %592 = vmatprep.subr.mxu1 %v641_v1  ;;  %v546_v22 = vld [vmem:[%s809_s2] ss:$0 sm:$0xff] }
  0x14   : > { %584 = vmatmul.mubr.msk.f32.vlgmr.msra.gmra.mxu0 %vm286_vm1, %v274_v8  ;;  %593 = vmatpush3.msra.mxu1 %v373_v9  ;;  %v548_v27 = vld [vmem:[%s811_s4] ss:$0 sm:$0xff] }
  0x15   : > { %594 = vmatprep.subr.mxu1 %v641_v1  ;;  %618 = vmatprep.mubr.msk.f32.mxu1 %vm642_vm0, %v641_v1  ;;  %v549_v42 = vld [vmem:[%s812_s5] ss:$0 sm:$0xff] }
  0x16   : > { %595 = vmatpush3.msra.mxu1 %v372_v10  ;;  %v550_v44 = vld [vmem:[%s813_s6] ss:$0 sm:$0xff] }
  0x17   : > { %596 = vmatprep.subr.mxu1 %v641_v1 }
  0x18   : > { %597 = vmatpush3.msra.mxu1 %v371_v11 }
  0x19   : > { %598 = vmatprep.subr.mxu1 %v641_v1 }
  0x1a   : > { %599 = vmatpush3.msra.mxu1 %v370_v12 }
  0x1b   : > { %600 = vmatprep.subr.mxu1 %v641_v1 }
  0x1c   : > { %601 = vmatpush3.msra.mxu1 %v369_v13 }
  0x1d   : > { %602 = vmatprep.subr.mxu1 %v641_v1 }
  0x1e   : > { %603 = vmatpush3.msra.mxu1 %v368_v14 }
  0x1f   : > { %604 = vmatprep.subr.mxu1 %v641_v1 }
  0x20   : > { %605 = vmatpush3.msra.mxu1 %v367_v15 }
  0x21   : > { %606 = vmatprep.subr.mxu1 %v641_v1 }
  0x22   : > { %607 = vmatpush3.msra.mxu1 %v366_v16 }
  0x23   : > { %608 = vmatprep.subr.mxu1 %v641_v1 }
  0x24   : > { %609 = vmatpush3.msra.mxu1 %v365_v17 }
  0x25   : > { %610 = vmatprep.subr.mxu1 %v641_v1 }
  0x26   : > { %611 = vmatpush3.msra.mxu1 %v364_v18 }
  0x27   : > { %612 = vmatprep.subr.mxu1 %v641_v1 }
  0x28   : > { %613 = vmatpush3.msra.mxu1 %v363_v19 }
  0x29   : > { %614 = vmatprep.subr.mxu1 %v641_v1 }
  0x2a   : > { %615 = vmatpush3.msra.mxu1 %v362_v20 }
  0x2b   : > { %616 = vmatprep.subr.mxu1 %v641_v1 }
  0x2c   : > { %617 = vmatpush3.msra.mxu1 %v361_v21 }
  0xd4   : > { %v356_v23 = vpop.f32.mrf.mxu0 }
  0xd5   : > { %v357_v24 = vadd.f32 %v546_v22, %v356_v23 }
  0xd6   : > { %v585_v25 = vpop.f32.mrf.mxu0 }
  0xd7   : > { %v360_v26 = vmax.f32 %v357_v24, 0.0 }
  0xd9   : > { %619 = vmatmul.mubr.f32.vlgmr.msra.gmra.mxu1 %v360_v26 }
 0x199   : > { %v450_v28 = vpop.f32.mrf.mxu1 }
 0x19a   : > { %v451_v29 = vadd.f32 %v548_v27, %v450_v28 }
 0x19b   : > { %v620_v30 = vpop.f32.mrf.mxu1 }
 0x19c   : > { %v454_v31 = vadd.f32 %v451_v29, %v274_v8 }
 0x19e   : > { %v455_v32 = vsel %vm286_vm1, %v454_v31, 0.0 }
 0x19f   : > { %456 = vadd.xlane.f32.xlu0 %v455_v32 }
 0x228   : > { %v457_v33 = vpop.xlane.xlu0 %456 }
 0x229   : > { %v459_v34 = vmul.f32 0.03125, %v457_v33 }
 0x22b   : > { %v460_v35 = vsub.f32 %v454_v31, %v459_v34 }
 0x22d   : > { %v461_v36 = vmul.f32 %v460_v35, %v460_v35 }
 0x22f   : > { %v462_v37 = vsel %vm286_vm1, %v461_v36, 0.0 }
 0x230   : > { %463 = vadd.xlane.f32.xlu0 %v462_v37 }
 0x2b9   : > { %v464_v38 = vpop.xlane.xlu0 %463 }
 0x2ba   : > { %v465_v39 = vmul.f32 0.03125, %v464_v38 }
 0x2bc   : > { %v466_v40 = vadd.f32 1e-05, %v465_v39 }
 0x2be   : > { %631 = vrsqrt.f32 %v466_v40 }
 0x2cb   : > { %v632_v41 = vpop.eup %631 }
 0x2cc   : > { %v468_v43 = vmul.f32 %v632_v41, %v460_v35 }
 0x2ce   : > { %v476_v45 = vmul.f32 %v549_v42, %v468_v43 }
 0x2d0   : > { %v484_v46 = vadd.f32 %v550_v44, %v476_v45 }
 0x2d2   : > { %485 = vst.msk [vmem:[%s273_s17] sm:$0xff] %vm286_vm1, %v484_v46 }
 0x2d3 PF: > { %s17_s24 = sadd.s32 1, %s639_s24  }
 0x2d4   : > { %p14_p4 = scmp.ge.s32.totalorder %s17_s24, 4  }
 0x2d6   :  { %16 = sbr.rel (!%p14_p4) target bundleno = 1 (0x1), region = 78 }

// kernel: transformer_forward.10
= control target key start
LH: loop header
LB: loop body
LE: loop exit
PB: predicated region body
PF: predicated region fallthrough
CT: control target
= control target key end

     0   :  { %s1664_s30 = smov 0   ;;  %s1818_s0 = inlined_call_operand.vmem [shape: f32[2,8,32], index: 0, kind: input, shape index: {}, may-alias: {0,1}]   ;;  %s1819_s1 = inlined_call_operand.vmem [shape: f32[2,8,32], index: 1, kind: input, shape index: {}, may-alias: {0,1}]   ;;  %s1820_s2 = inlined_call_operand.vmem [shape: f32[32,96], index: 2, kind: input, shape index: {}]   ;;  %s1821_s3 = inlined_call_operand.vmem [shape: f32[1,96], index: 3, kind: input, shape index: {}]   ;;  %s1822_s4 = inlined_call_operand.vmem [shape: f32[32,32], index: 4, kind: input, shape index: {}]   ;;  %s1823_s5 = inlined_call_operand.vmem [shape: f32[1,32], index: 5, kind: input, shape index: {}]   ;;  %s1824_s6 = inlined_call_operand.vmem [shape: f32[2,8,8], index: 6, kind: input, shape index: {}]   ;;  %s1825_s7 = inlined_call_operand.vmem [shape: f32[1,32], index: 7, kind: input, shape index: {}]   ;;  %s1826_s8 = inlined_call_operand.vmem [shape: f32[1,32], index: 8, kind: input, shape index: {}]   ;;  %s1827_s9 = inlined_call_operand.vmem [shape: f32[2,8,32], index: 9, kind: output, shape index: {}]  }
   0x1 LB: > { %s1422_s10 = sadd.s32 4294967295, %s1600_s30   ;;  %p1426_p0 = scmp.ge.s32.totalorder %s1600_s30, 1  ;;  %s1600_s30 = sphi %s1664_s30, %s19_s30  }
   0x2   : > { %p304_p1 = scmp.lt.s32.totalorder %s1600_s30, 3 }
   0x4   : > { %p305_p2 = pnand %p1426_p0, %p304_p1 }
   0x5   : > { %s1602_s15 = smov (!%p305_p2), 96   ;;  %p346_p3 = scmp.lt.s32.totalorder (!%p305_p2), %s1422_s10, 1 }
   0x6   : > { %308 = sbr.rel (%p305_p2) target bundleno = 1788 (0x6fc), region = 56  ;;  %s1605_s29 = smov (!%p305_p2), 120  }
   0x7   : > { %s1607_s11 = smov (!%p305_p2), 104   ;;  %s1608_s16 = smov (!%p305_p2), 88  }
   0x8   : > { %s1610_s17 = smov (!%p305_p2), 72   ;;  %s1611_s27 = smov (!%p305_p2), 8  }
   0xb   : > { %v367_v0 = vld [vmem:[%s1820_s2 + $0x18] sm:$0xff]  ;;  %v365_v1 = vld [vmem:[%s1820_s2 + $0x8] sm:$0xff]  ;;  %v366_v2 = vld [vmem:[%s1820_s2 + $0x10] sm:$0xff]  ;;  %v1603_v4 = vmov 0.0   ;;  %vm1604_vm0 = vmmov 0   ;;  %s1829_s10 = smov (!%p346_p3, %s1422_s10), 1 }
   0xc   : > { %460 = vrot.lane.b32.xlu0 %v367_v0, %s1602_s15  ;;  %456 = vrot.lane.b32.xlu1 %v365_v1, %s1602_s15  ;;  %v364_v3 = vld [vmem:[%s1820_s2] sm:$0xff]  ;;  %s1695_s20 = sshll.u32 %s1829_s10, 3  ;;  %vm376_vm1 = vcmask 261120   ;;  %s1606_s10 = smov 112   ;;  %vm542_vm2 = vcmask 64512   ;;  %vm880_vm3 = vcmask 130112  }
   0xd   : > { %1483 = vmatprep.subr.mxu0 %v1603_v4  ;;  %1494 = vmatprep.subr.mxu1 %v1603_v4  ;;  %s349_s23 = scalar_lea.vmem %s1818_s0, %s1695_s20  ;;  %v1431_v5 = vld [vmem:[%s1821_s3] ss:$0 sm:$0xff]  ;;  %s353_s28 = scalar_lea.vmem %s1819_s1, %s1695_s20  ;;  %vm1053_vm4 = vcmask 195712   ;;  %vm1226_vm5 = vcmask 261312  }
   0xe   : > { %1484 = vmatpush3.msra.mxu0 %v367_v0  ;;  %1491 = vmatprep.mubr.msk.f32.mxu0 %vm1604_vm0, %v1603_v4  ;;  %v1705_v6 = vld [vmem:[%s349_s23] sm:$0xff]  ;;  %s357_s14 = scalar_lea.vmem %s1824_s6, %s1695_s20  ;;  %s361_s18 = scalar_lea.vmem %s1827_s9, %s1695_s20 }
   0xf   : > { %1485 = vmatprep.subr.mxu0 %v1603_v4  ;;  %1502 = vmatprep.mubr.msk.f32.mxu1 %vm1604_vm0, %v1603_v4  ;;  %v363_v11 = vld [vmem:[%s353_s28] sm:$0xff]  ;;  %s1612_s28 = smov 16  }
  0x10   : > { %458 = vrot.lane.b32.xlu0 %v366_v2, %s1602_s15  ;;  %454 = vrot.lane.b32.xlu1 %v364_v3, %s1602_s15  ;;  %v369_v26 = vld [vmem:[%s357_s14] sm:$0xff] }
  0x11   : > { %1486 = vmatpush3.msra.mxu0 %v366_v2 }
  0x12   : > { %1487 = vmatprep.subr.mxu0 %v1603_v4 }
  0x13   : > { %1488 = vmatpush3.msra.mxu0 %v365_v1 }
  0x14   : > { %1489 = vmatprep.subr.mxu0 %v1603_v4  ;;  %466 = vrot.lane.b32.xlu0 %v1431_v5, %s1602_s15 }
  0x15   : > { %1490 = vmatpush3.msra.mxu0 %v364_v3 }
  0x16   : > { %1492 = vmatmul.mubr.msk.f32.vlgmr.msra.gmra.mxu0 %vm376_vm1, %v1705_v6  ;;  %1515 = vmatprep.subr.mxu0 %v1603_v4 }
  0x17   : > { %1517 = vmatprep.mubr.msk.f32.mxu0 %vm1604_vm0, %v1603_v4 }
  0x7e   : > { %v461_v7 = vpop.permute.xlu0 %460  ;;  %v457_v8 = vpop.permute.xlu1 %456 }
  0x7f   : > { %1495 = vmatpush3.msra.mxu1 %v461_v7 }
  0x80   : > { %1496 = vmatprep.subr.mxu1 %v1603_v4 }
  0x82   : > { %v459_v9 = vpop.permute.xlu0 %458  ;;  %v455_v10 = vpop.permute.xlu1 %454 }
  0x83   : > { %1497 = vmatpush3.msra.mxu1 %v459_v9 }
  0x84   : > { %1498 = vmatprep.subr.mxu1 %v1603_v4 }
  0x85   : > { %1499 = vmatpush3.msra.mxu1 %v457_v8 }
  0x86   : > { %1500 = vmatprep.subr.mxu1 %v1603_v4  ;;  %v467_v15 = vpop.permute.xlu0 %466 }
  0x87   : > { %1501 = vmatpush3.msra.mxu1 %v455_v10 }
  0x88   : > { %1503 = vmatmul.mubr.msk.f32.vlgmr.msra.gmra.mxu1 %vm376_vm1, %v363_v11  ;;  %1505 = vmatprep.subr.mxu1 %v1603_v4 }
  0x89   : > { %1507 = vmatprep.mubr.msk.f32.mxu1 %vm1604_vm0, %v1603_v4 }
  0xd6   : > { %v446_v12 = vpop.f32.mrf.mxu0 }
  0xd7   : > { %v447_v13 = vadd.f32 %v1431_v5, %v446_v12 }
  0xd8   : > { %v1493_v14 = vpop.f32.mrf.mxu0 }
  0xd9   : > { %709 = vrot.lane.b32.xlu0 %v447_v13, %s1605_s29 }
  0xdd   : > { %882 = vrot.lane.b32.xlu0 %v447_v13, %s1606_s10 }
  0xe1   : > { %1055 = vrot.lane.b32.xlu0 %v447_v13, %s1607_s11 }
 0x148   : > { %v538_v16 = vpop.f32.mrf.mxu1 }
 0x149   : > { %v1725_v17 = vadd.f32 %v538_v16, %v467_v15 }
 0x14a   : > { %v1504_v18 = vpop.f32.mrf.mxu1 }
 0x14b   : > { %711 = vrot.lane.b32.xlu1 %v1725_v17, %s1605_s29  ;;  %1506 = vmatpush3.xpose.msk.msra.mxu1 %vm542_vm2, %v1725_v17  ;;  %v710_v19 = vpop.permute.xlu0 %709  ;;  %s1613_s29 = smov 24  }
 0x14c   : > { %1510 = vmatprep.subr.mxu1 %v1603_v4 }
 0x14e   : > { %1508 = vmatmul.mubr.msk.f32.vlgmr.msra.gmra.mxu1 %vm542_vm2, %v447_v13 }
 0x14f   : > { %884 = vrot.lane.b32.xlu1 %v1725_v17, %s1606_s10  ;;  %1512 = vmatprep.mubr.msk.f32.mxu1 %vm1604_vm0, %v1603_v4  ;;  %v883_v22 = vpop.permute.xlu0 %882 }
 0x153   : > { %1057 = vrot.lane.b32.xlu1 %v1725_v17, %s1607_s11  ;;  %v1056_v24 = vpop.permute.xlu0 %1055 }
 0x1bd   : > { %v712_v20 = vpop.permute.xlu1 %711 }
 0x1be   : > { %1516 = vmatpush3.xpose.msk.msra.mxu0 %vm542_vm2, %v712_v20 }
 0x1bf   : > { %1525 = vmatprep.subr.mxu0 %v1603_v4 }
 0x1c1   : > { %v885_v21 = vpop.permute.xlu1 %884  ;;  %1518 = vmatmul.mubr.msk.f32.vlgmr.msra.gmra.mxu0 %vm542_vm2, %v710_v19 }
 0x1c2   : > { %1526 = vmatpush3.xpose.msk.msra.mxu0 %vm542_vm2, %v885_v21  ;;  %1527 = vmatprep.mubr.msk.f32.mxu0 %vm1604_vm0, %v1603_v4 }
 0x1c3   : > { %1535 = vmatprep.subr.mxu0 %v1603_v4 }
 0x1c5   : > { %v1058_v23 = vpop.permute.xlu1 %1057  ;;  %1528 = vmatmul.mubr.msk.f32.vlgmr.msra.gmra.mxu0 %vm542_vm2, %v883_v22  ;;  %v1232_v22 = vld [vmem:[%s1822_s4 + $0x18] sm:$0xff] }
 0x1c6   : > { %1536 = vmatpush3.xpose.msk.msra.mxu0 %vm542_vm2, %v1058_v23  ;;  %1537 = vmatprep.mubr.msk.f32.mxu0 %vm1604_vm0, %v1603_v4  ;;  %v1231_v23 = vld [vmem:[%s1822_s4 + $0x10] sm:$0xff] }
 0x1c7   : > { %1545 = vmatprep.subr.mxu0 %v1603_v4 }
 0x1c9   : > { %1538 = vmatmul.mubr.msk.f32.vlgmr.msra.gmra.mxu0 %vm542_vm2, %v1056_v24  ;;  %v1230_v24 = vld [vmem:[%s1822_s4 + $0x8] sm:$0xff] }
 0x1ca   : > { %1553 = vmatprep.mubr.msk.f32.mxu0 %vm1604_vm0, %v1603_v4  ;;  %1546 = vmatpush3.msra.mxu0 %v1232_v22 }
 0x1cb   : > { %1547 = vmatprep.subr.mxu0 %v1603_v4 }
 0x1cc   : > { %1548 = vmatpush3.msra.mxu0 %v1231_v23 }
 0x1cd   : > { %1549 = vmatprep.subr.mxu0 %v1603_v4 }
 0x1ce   : > { %1550 = vmatpush3.msra.mxu0 %v1230_v24 }
 0x1cf   : > { %1551 = vmatprep.subr.mxu0 %v1603_v4 }
 0x20e   : > { %v615_v25 = vpop.f32.mrf.mxu1 }
 0x20f   : > { %v619_v27 = vmul.f32 0.35355338, %v615_v25 }
 0x210   : > { %v1509_v28 = vpop.f32.mrf.mxu1 }
 0x211   : > { %v620_v29 = vmin.f32 %v619_v27, %v369_v26 }
 0x213   : > { %v621_v30 = vsel %vm542_vm2, %v620_v29, -inf }
 0x214   : > { %622 = vmax.xlane.f32.xlu1 %v621_v30 }
 0x281   : > { %v783_v31 = vpop.f32.mrf.mxu0 }
 0x282   : > { %v787_v32 = vmul.f32 0.35355338, %v783_v31 }
 0x283   : > { %v1519_v33 = vpop.f32.mrf.mxu0 }
 0x284   : > { %v788_v34 = vmin.f32 %v787_v32, %v369_v26 }
 0x285   : > { %v956_v35 = vpop.f32.mrf.mxu0 }
 0x286   : > { %v960_v36 = vmul.f32 0.35355338, %v956_v35  ;;  %v789_v37 = vsel %vm542_vm2, %v788_v34, -inf }
 0x287   : > { %790 = vmax.xlane.f32.xlu0 %v789_v37  ;;  %v1529_v38 = vpop.f32.mrf.mxu0 }
 0x288   : > { %v961_v39 = vmin.f32 %v960_v36, %v369_v26 }
 0x289   : > { %v1129_v40 = vpop.f32.mrf.mxu0 }
 0x28a   : > { %v1133_v41 = vmul.f32 0.35355338, %v1129_v40  ;;  %v962_v42 = vsel %vm542_vm2, %v961_v39, -inf }
 0x28b   : > { %963 = vmax.xlane.f32.xlu0 %v962_v42  ;;  %v1539_v43 = vpop.f32.mrf.mxu0 }
 0x28c   : > { %v1134_v44 = vmin.f32 %v1133_v41, %v369_v26  ;;  %v1229_v26 = vld [vmem:[%s1822_s4] sm:$0xff] }
 0x28d   : > { %1552 = vmatpush3.msra.mxu0 %v1229_v26 }
 0x28e   : > { %v1135_v45 = vsel %vm542_vm2, %v1134_v44, -inf }
 0x28f   : > { %1136 = vmax.xlane.f32.xlu1 %v1135_v45 }
 0x29d   : > { %v623_v46 = vpop.xlane.xlu1 %622 }
 0x29e   : > { %v624_v47 = vsub.f32 %v620_v29, %v623_v46 }
 0x2a0   : > { %v625_v48 = vmul.f32 1.442695, %v624_v47  ;;  %800 = vrot.lane.b32.xlu1 %v1725_v17, %s1608_s16 }
 0x2a2   : > { %1576 = vpow2.f32 %v625_v48 }
 0x2af   : > { %v1577_v49 = vpop.eup %1576 }
 0x2b0   : > { %v627_v50 = vsel %vm542_vm2, %v1577_v49, 0.0 }
 0x2b1   : > { %628 = vadd.xlane.f32.xlu0 %v627_v50 }
 0x2c7   : > { %632 = vrot.lane.b32.xlu0 %v1725_v17, %s1602_s15  ;;  %s1609_s15 = smov 80  }
 0x310   : > { %v791_v51 = vpop.xlane.xlu0 %790 }
 0x311   : > { %v792_v52 = vsub.f32 %v788_v34, %v791_v51  ;;  %v1449_v51 = vld [vmem:[%s1826_s8] ss:$0 sm:$0xff] }
 0x313   : > { %v793_v53 = vmul.f32 1.442695, %v792_v52 }
 0x314   : > { %v964_v54 = vpop.xlane.xlu0 %963 }
 0x315   : > { %1578 = vpow2.f32 %v793_v53  ;;  %v965_v55 = vsub.f32 %v961_v39, %v964_v54 }
 0x317   : > { %v966_v56 = vmul.f32 1.442695, %v965_v55 }
 0x318   : > { %v1137_v57 = vpop.xlane.xlu1 %1136 }
 0x319   : > { %1580 = vpow2.f32 %v966_v56  ;;  %v1138_v58 = vsub.f32 %v1134_v44, %v1137_v57 }
 0x31b   : > { %v1139_v59 = vmul.f32 1.442695, %v1138_v58 }
 0x31c   : > { %v801_v8 = vpop.permute.xlu1 %800 }
 0x31d   : > { %1582 = vpow2.f32 %v1139_v59 }
 0x322   : > { %v1579_v60 = vpop.eup %1578 }
 0x323   : > { %v795_v61 = vsel %vm542_vm2, %v1579_v60, 0.0 }
 0x324   : > { %796 = vadd.xlane.f32.xlu1 %v795_v61 }
 0x326   : > { %v1581_v62 = vpop.eup %1580 }
 0x327   : > { %v968_v63 = vsel %vm542_vm2, %v1581_v62, 0.0 }
 0x328   : > { %969 = vadd.xlane.f32.xlu0 %v968_v63 }
 0x32a   : > { %v1583_v0 = vpop.eup %1582 }
 0x32b   : > { %v1141_v1 = vsel %vm542_vm2, %v1583_v0, 0.0 }
 0x32c   : > { %1142 = vadd.xlane.f32.xlu1 %v1141_v1 }
 0x33a   : > { %v629_v2 = vpop.xlane.xlu0 %628 }
 0x33b   : > { %1584 = vrcp.f32 %v629_v2 }
 0x33d   : > { %973 = vrot.lane.b32.xlu1 %v1725_v17, %s1609_s15 }
 0x33e   : > { %1146 = vrot.lane.b32.xlu0 %v1725_v17, %s1610_s17  ;;  %v633_v3 = vpop.permute.xlu0 %632 }
 0x33f   : > { %1511 = vmatpush3.msra.mxu1 %v633_v3 }
 0x340   : > { %1520 = vmatprep.subr.mxu1 %v1603_v4 }
 0x348   : > { %v1585_v5 = vpop.eup %1584 }
 0x349   : > { %v631_v7 = vmul.f32 %v1585_v5, %v1577_v49 }
 0x34b   : > { %1513 = vmatmul.mubr.msk.f32.vlgmr.msra.gmra.mxu1 %vm542_vm2, %v631_v7 }
 0x34c   : > { %1521 = vmatpush3.msra.mxu1 %v801_v8  ;;  %1522 = vmatprep.mubr.msk.f32.mxu1 %vm1604_vm0, %v1603_v4 }
 0x34d   : > { %1530 = vmatprep.subr.mxu1 %v1603_v4 }
 0x3ad   : > { %v797_v9 = vpop.xlane.xlu1 %796 }
 0x3ae   : > { %1586 = vrcp.f32 %v797_v9 }
 0x3b1   : > { %v970_v10 = vpop.xlane.xlu0 %969 }
 0x3b2   : > { %1588 = vrcp.f32 %v970_v10 }
 0x3b5   : > { %v1143_v11 = vpop.xlane.xlu1 %1142  ;;  %v1147_v17 = vpop.permute.xlu0 %1146 }
 0x3b6   : > { %1590 = vrcp.f32 %v1143_v11 }
 0x3b9   : > { %v974_v14 = vpop.permute.xlu1 %973 }
 0x3bb   : > { %v1587_v12 = vpop.eup %1586 }
 0x3bc   : > { %v799_v13 = vmul.f32 %v1587_v12, %v1579_v60 }
 0x3be   : > { %1523 = vmatmul.mubr.msk.f32.vlgmr.msra.gmra.mxu1 %vm542_vm2, %v799_v13 }
 0x3bf   : > { %v1589_v15 = vpop.eup %1588  ;;  %1531 = vmatpush3.msra.mxu1 %v974_v14  ;;  %1532 = vmatprep.mubr.msk.f32.mxu1 %vm1604_vm0, %v1603_v4 }
 0x3c0   : > { %1540 = vmatprep.subr.mxu1 %v1603_v4  ;;  %v972_v16 = vmul.f32 %v1589_v15, %v1581_v62 }
 0x3c2   : > { %1533 = vmatmul.mubr.msk.f32.vlgmr.msra.gmra.mxu1 %vm542_vm2, %v972_v16 }
 0x3c3   : > { %v1591_v18 = vpop.eup %1590  ;;  %1541 = vmatpush3.msra.mxu1 %v1147_v17  ;;  %1542 = vmatprep.mubr.msk.f32.mxu1 %vm1604_vm0, %v1603_v4  ;;  %v1446_v4 = vld [vmem:[%s1823_s5] ss:$0 sm:$0xff] }
 0x3c4   : > { %v1145_v19 = vmul.f32 %v1591_v18, %v1583_v0 }
 0x3c6   : > { %1543 = vmatmul.mubr.msk.f32.vlgmr.msra.gmra.mxu1 %vm542_vm2, %v1145_v19 }
 0x40b   : > { %v704_v20 = vpop.f32.mrf.mxu1 }
 0x40c   : > { %708 = vst.msk [vmem:[#allocation2] sm:$0xff] %vm542_vm2, %v704_v20 }
 0x40d   : > { %v1514_v21 = vpop.f32.mrf.mxu1 }
 0x47e   : > { %v872_v25 = vpop.f32.mrf.mxu1 }
 0x47f   : > { %877 = vrot.lane.b32.xlu1 %v872_v25, %s1611_s27 }
 0x480   : > { %v1524_v27 = vpop.f32.mrf.mxu1 }
 0x482   : > { %v1045_v28 = vpop.f32.mrf.mxu1 }
 0x483   : > { %1050 = vrot.lane.b32.xlu0 %v1045_v28, %s1612_s28 }
 0x484   : > { %v1534_v29 = vpop.f32.mrf.mxu1 }
 0x486   : > { %v1218_v30 = vpop.f32.mrf.mxu1 }
 0x487   : > { %1223 = vrot.lane.b32.xlu1 %v1218_v30, %s1613_s29 }
 0x488   : > { %v1544_v31 = vpop.f32.mrf.mxu1 }
 0x4f1   : > { %v878_v32 = vpop.permute.xlu1 %877 }
 0x4f2   : > { %881 = vst.msk [vmem:[#allocation2] sm:$0xff] %vm880_vm3, %v878_v32 }
 0x4f5   : > { %v1051_v33 = vpop.permute.xlu0 %1050 }
 0x4f6   : > { %1054 = vst.msk [vmem:[#allocation2] sm:$0xff] %vm1053_vm4, %v1051_v33 }
 0x4f9   : > { %v1224_v34 = vpop.permute.xlu1 %1223 }
 0x4fa   : > { %1227 = vst.msk [vmem:[#allocation2] sm:$0xff] %vm1226_vm5, %v1224_v34 }
 0x501   : > { %v1228_v35 = vld [vmem:[#allocation2] sm:$0xff] }
 0x502   : > { %1554 = vmatmul.mubr.msk.f32.vlgmr.msra.gmra.mxu0 %vm376_vm1, %v1228_v35 }
 0x5c2   : > { %v1309_v36 = vpop.f32.mrf.mxu0 }
 0x5c3   : > { %v1310_v37 = vadd.f32 %v1446_v4, %v1309_v36 }
 0x5c4   : > { %v1555_v38 = vpop.f32.mrf.mxu0 }
 0x5c5   : > { %v1313_v39 = vadd.f32 %v1310_v37, %v1705_v6  ;;  %v1448_v6 = vld [vmem:[%s1825_s7] ss:$0 sm:$0xff] }
 0x5c7   : > { %v1314_v40 = vsel %vm376_vm1, %v1313_v39, 0.0 }
 0x5c8   : > { %1315 = vadd.xlane.f32.xlu0 %v1314_v40 }
 0x651   : > { %v1316_v41 = vpop.xlane.xlu0 %1315 }
 0x652   : > { %v1318_v42 = vmul.f32 0.03125, %v1316_v41 }
 0x654   : > { %v1319_v43 = vsub.f32 %v1313_v39, %v1318_v42 }
 0x656   : > { %v1320_v44 = vmul.f32 %v1319_v43, %v1319_v43 }
 0x658   : > { %v1321_v45 = vsel %vm376_vm1, %v1320_v44, 0.0 }
 0x659   : > { %1322 = vadd.xlane.f32.xlu1 %v1321_v45 }
 0x6e2   : > { %v1323_v46 = vpop.xlane.xlu1 %1322 }
 0x6e3   : > { %v1324_v47 = vmul.f32 0.03125, %v1323_v46 }
 0x6e5   : > { %v1325_v48 = vadd.f32 1e-05, %v1324_v47 }
 0x6e7   : > { %1592 = vrsqrt.f32 %v1325_v48 }
 0x6f4   : > { %v1593_v49 = vpop.eup %1592 }
 0x6f5   : > { %v1327_v50 = vmul.f32 %v1593_v49, %v1319_v43 }
 0x6f7   : > { %v1335_v52 = vmul.f32 %v1448_v6, %v1327_v50 }
 0x6f9   : > { %v1343_v53 = vadd.f32 %v1449_v51, %v1335_v52 }
 0x6fb   : > { %1344 = vst.msk [vmem:[%s361_s18] sm:$0xff] %vm376_vm1, %v1343_v53 }
 0x6fc PF: > { %s19_s30 = sadd.s32 1, %s1600_s30  }
 0x6fd   : > { %p16_p4 = scmp.ge.s32.totalorder %s19_s30, 4  }
 0x6ff   :  { %18 = sbr.rel (!%p16_p4) target bundleno = 1 (0x1), region = 92 }

</bundles_post_ra>
